<compile_context>
chip_gen: v6e
topology: v6e:2x2x1
jax: 0.10.0
libtpu: 0.0.40
codegen_flags: <defaults>
</compile_context>

<pallas_src>
import functools

import jax
import jax.numpy as jnp
from jax.experimental import pallas as pl
from jax.experimental.pallas import tpu as pltpu


def _round_up(n, m):
    return ((n + m - 1) // m) * m


# ---------------------------------------------------------------------------
# Kernel
# ---------------------------------------------------------------------------
def _mlp_deep_kernel(x_ref, w0_ref, wmid_ref, wlast_ref, bhid_ref, blast_ref,
                     o_ref):
    """Fused MLP_deep: Linear+ReLU, 3x (Linear+ReLU), final Linear.

    x_ref    : [TB, F_in]   f32  (one batch tile, lane-padded input)
    w0_ref   : [F_in, F_hid]      matmul dtype (f32 or bf16), zero padded
    wmid_ref : [3, F_hid, F_hid]  matmul dtype, zero padded
    wlast_ref: [F_hid, F_out]     matmul dtype, zero padded
    bhid_ref : [8, F_hid]   f32  (rows 0..3 = hidden biases, rest zero)
    blast_ref: [8, F_out]   f32  (row 0 = output bias, rest zero)
    o_ref    : [TB, F_out]  f32
    """
    mm_dtype = w0_ref.dtype  # bf16 fast path or f32 exact path

    # Layer 0: in -> hidden, ReLU.  MXU matmul, f32 accumulation.
    h = x_ref[...].astype(mm_dtype)
    z = jnp.dot(h, w0_ref[...], preferred_element_type=jnp.float32)
    h = jnp.maximum(z + bhid_ref[0:1, :], 0.0).astype(mm_dtype)

    # Layers 1..3: hidden -> hidden, ReLU.  Activation kept in mm_dtype
    # between layers (single cast per layer after the f32 bias+ReLU).
    n_mid = wmid_ref.shape[0]
    for l in range(n_mid):
        z = jnp.dot(h, wmid_ref[l], preferred_element_type=jnp.float32)
        h = jnp.maximum(z + bhid_ref[l + 1:l + 2, :], 0.0).astype(mm_dtype)

    # Final layer: hidden -> out (no ReLU), f32 result.
    z = jnp.dot(h, wlast_ref[...], preferred_element_type=jnp.float32)
    o_ref[...] = (z + blast_ref[0:1, :]).astype(o_ref.dtype)


# ---------------------------------------------------------------------------
# One-time parameter packing (outside the per-call jitted path)
# ---------------------------------------------------------------------------
def pack_params(params, matmul_dtype=jnp.float32):
    """Pack PyTorch-style (W, b) params into lane-dense Pallas slabs.

    Weights are stored [in_features, out_features].  Zero padding is exact
    through the ReLU layers.  Returns (slabs, out_dim).
    """
    ws = list(params[0::2])
    bs = list(params[1::2])
    in_dim, hidden = ws[0].shape
    out_dim = ws[-1].shape[1]

    f_in = _round_up(in_dim, 128)
    f_hid = _round_up(hidden, 128)
    f_out = _round_up(out_dim, 128)

    w0 = jnp.pad(ws[0], ((0, f_in - in_dim), (0, f_hid - hidden)))
    w0 = w0.astype(matmul_dtype)
    w_mid = jnp.stack(
        [jnp.pad(w, ((0, f_hid - hidden), (0, f_hid - hidden)))
         for w in ws[1:-1]]).astype(matmul_dtype)
    w_last = jnp.pad(ws[-1], ((0, f_hid - hidden), (0, f_out - out_dim)))
    w_last = w_last.astype(matmul_dtype)

    b_hid = jnp.stack([jnp.pad(b, (0, f_hid - hidden)) for b in bs[:-1]])
    b_hid = jnp.pad(b_hid.astype(jnp.float32),
                    ((0, 8 - b_hid.shape[0]), (0, 0)))
    b_last = jnp.pad(bs[-1], (0, f_out - out_dim)).astype(jnp.float32)
    b_last = jnp.pad(b_last.reshape(1, -1), ((0, 7), (0, 0)))

    slabs = (w0, w_mid, w_last, b_hid, b_last)
    return jax.tree_util.tree_map(jnp.asarray, slabs), out_dim


# ---------------------------------------------------------------------------
# Forward
# ---------------------------------------------------------------------------
def _pick_block_b(batch):
    """Batch tile: multiple of 16 (bf16-safe), capped at 512, and split into
    at least 2 grid steps for moderate batches so both v7x TCs get work."""
    sub = 16
    block_b = min(_round_up(batch, sub), 512)
    b_pad = _round_up(batch, block_b)
    if b_pad // block_b == 1 and batch > 64:
        block_b = _round_up(pl.cdiv(b_pad, 2), sub)
        b_pad = _round_up(batch, block_b)
    return block_b, b_pad


@functools.partial(jax.jit, static_argnames=("out_dim",))
def mlp_deep_forward(x, y, packed, *, out_dim):
    """Fused MLP_deep forward. `y` is accepted and ignored (as in PyTorch)."""
    del y
    w0, w_mid, w_last, b_hid, b_last = packed
    batch, in_dim = x.shape
    f_in, f_hid = w0.shape
    f_out = w_last.shape[1]
    n_mid = w_mid.shape[0]

    block_b, b_pad = _pick_block_b(batch)
    x_p = jnp.pad(x.astype(jnp.float32),
                  ((0, b_pad - batch), (0, f_in - in_dim)))

    resident = dict(pipeline_mode=pl.Buffered(1))  # constant-index blocks

    out = pl.pallas_call(
        _mlp_deep_kernel,
        out_shape=jax.ShapeDtypeStruct((b_pad, f_out), jnp.float32),
        grid=(b_pad // block_b,),
        in_specs=[
            pl.BlockSpec((block_b, f_in), lambda i: (i, 0)),          # x tile
            pl.BlockSpec((f_in, f_hid), lambda i: (0, 0), **resident),
            pl.BlockSpec((n_mid, f_hid, f_hid), lambda i: (0, 0, 0),
                         **resident),
            pl.BlockSpec((f_hid, f_out), lambda i: (0, 0), **resident),
            pl.BlockSpec((8, f_hid), lambda i: (0, 0), **resident),
            pl.BlockSpec((8, f_out), lambda i: (0, 0), **resident),
        ],
        out_specs=pl.BlockSpec((block_b, f_out), lambda i: (i, 0)),
        compiler_params=pltpu.CompilerParams(
            dimension_semantics=("parallel",),
            # ~2.3 MB weights (f32) + a few batch tiles: well under the
            # 64 MiB v7x physical VMEM ceiling even at block_b=512.
            vmem_limit_bytes=48 * 1024 * 1024,
        ),
    )(x_p, w0, w_mid, w_last, b_hid, b_last)

    return out[:batch, :out_dim]


# ---------------------------------------------------------------------------
# Init + pure-JAX reference
# ---------------------------------------------------------------------------
def init_params(key, input_size, output_size, hidden_dim=320):
    """PyTorch-default-like Linear init; weights stored as [in, out]."""
    sizes = [input_size] + [hidden_dim] * 4 + [output_size]
    ks = jax.random.split(key, 2 * (len(sizes) - 1))
    params = []
    for i, (fi, fo) in enumerate(zip(sizes[:-1], sizes[1:])):
        bound = 1.0 / float(fi) ** 0.5
        w = jax.random.uniform(ks[2 * i], (fi, fo), jnp.float32, -bound, bound)
        b = jax.random.uniform(ks[2 * i + 1], (fo,), jnp.float32, -bound, bound)
        params += [w, b]
    return tuple(params)


def reference_forward(x, params):
    """Pure-JAX reference mirroring the PyTorch MLP_deep forward."""
    ws = params[0::2]
    bs = params[1::2]
    h = x
    for w, b in zip(ws[:-1], bs[:-1]):
        h = jnp.maximum(h @ w + b, 0.0)
    return h @ ws[-1] + bs[-1]


if __name__ == "__main__":
    # Hidden width 320 is fixed by the module; in/out sizes kept small.
    input_size, output_size = 16, 8
    batch = 16

    key = jax.random.PRNGKey(0)
    kx, ky, kp = jax.random.split(key, 3)

    x = jax.random.normal(kx, (batch, input_size), jnp.float32)
    y = jax.random.normal(ky, (batch, output_size), jnp.float32)  # unused
    params = init_params(kp, input_size, output_size)
    ref = reference_forward(x, params)

    # f32 matmul path (exact PyTorch semantics).  Packing is one-time.
    packed_f32, out_dim = pack_params(params, matmul_dtype=jnp.float32)
    out = jax.block_until_ready(mlp_deep_forward(x, y, packed_f32,
                                                 out_dim=out_dim))
    assert out.shape == (batch, output_size)
    assert float(jnp.max(jnp.abs(out - ref))) < 2e-3

    # bf16-operand matmul path (recommended on v5e/v6e/v7x), f32 accumulation.
    packed_bf16, _ = pack_params(params, matmul_dtype=jnp.bfloat16)
    out_bf16 = jax.block_until_ready(mlp_deep_forward(x, y, packed_bf16,
                                                      out_dim=out_dim))
    assert out_bf16.shape == (batch, output_size)
    assert float(jnp.max(jnp.abs(out_bf16 - ref))) < 1e-1

    print("KERNEL_OK")
</pallas_src>

<mosaic_0001>
module attributes {stable_mosaic.version = 11 : i64} {
  func.func @_mlp_deep_kernel(%arg0: i32, %arg1: memref<16x128xf32, #tpu.memory_space<vmem>>, %arg2: memref<128x384xf32, #tpu.memory_space<vmem>>, %arg3: memref<3x384x384xf32, #tpu.memory_space<vmem>>, %arg4: memref<384x128xf32, #tpu.memory_space<vmem>>, %arg5: memref<8x384xf32, #tpu.memory_space<vmem>>, %arg6: memref<8x128xf32, #tpu.memory_space<vmem>>, %arg7: memref<16x128xf32, #tpu.memory_space<vmem>>) attributes {dimension_semantics = [#tpu.dimension_semantics<parallel>], iteration_bounds = array<i64: 1>, scalar_prefetch = 0 : i64, scratch_operands = 0 : i64, tpu.core_type = #tpu.core_type<tc>, window_params = [{transform_indices = @transform_0, window_bounds = array<i64: 16, 128>}, {pipeline_mode = #tpu.pipeline_mode<synchronous>, transform_indices = @transform_1, window_bounds = array<i64: 128, 384>}, {pipeline_mode = #tpu.pipeline_mode<synchronous>, transform_indices = @transform_2, window_bounds = array<i64: 3, 384, 384>}, {pipeline_mode = #tpu.pipeline_mode<synchronous>, transform_indices = @transform_3, window_bounds = array<i64: 384, 128>}, {pipeline_mode = #tpu.pipeline_mode<synchronous>, transform_indices = @transform_4, window_bounds = array<i64: 8, 384>}, {pipeline_mode = #tpu.pipeline_mode<synchronous>, transform_indices = @transform_5, window_bounds = array<i64: 8, 128>}, {transform_indices = @transform_6, window_bounds = array<i64: 16, 128>}]} {
    %c0 = arith.constant 0 : index
    %c0_0 = arith.constant 0 : index
    %0 = vector.load %arg1[%c0, %c0_0] : memref<16x128xf32, #tpu.memory_space<vmem>>, vector<16x128xf32>
    %c0_1 = arith.constant 0 : index
    %c0_2 = arith.constant 0 : index
    %1 = vector.load %arg2[%c0_1, %c0_2] : memref<128x384xf32, #tpu.memory_space<vmem>>, vector<128x384xf32>
    %cst = arith.constant dense<0.000000e+00> : vector<16x384xf32>
    %2 = tpu.matmul %0, %1, %cst {dimension_numbers = #tpu.dot_dimension_numbers<[1], [0], [0], [1], [0, 0, 1, 1], [], []>} : vector<16x128xf32>, vector<128x384xf32>, vector<16x384xf32> -> vector<16x384xf32>
    %c0_3 = arith.constant 0 : index
    %c0_4 = arith.constant 0 : index
    %3 = vector.load %arg5[%c0_3, %c0_4] : memref<8x384xf32, #tpu.memory_space<vmem>>, vector<1x384xf32>
    %4 = vector.broadcast %3 : vector<1x384xf32> to vector<16x384xf32>
    %5 = arith.addf %2, %4 : vector<16x384xf32>
    %cst_5 = arith.constant 0.000000e+00 : f32
    %6 = vector.broadcast %cst_5 : f32 to vector<16x384xf32>
    %7 = arith.maximumf %5, %6 : vector<16x384xf32>
    %c0_6 = arith.constant 0 : index
    %c0_7 = arith.constant 0 : index
    %c0_8 = arith.constant 0 : index
    %8 = vector.load %arg3[%c0_6, %c0_7, %c0_8] : memref<3x384x384xf32, #tpu.memory_space<vmem>>, vector<1x384x384xf32>
    %9 = vector.shape_cast %8 : vector<1x384x384xf32> to vector<384x384xf32>
    %cst_9 = arith.constant dense<0.000000e+00> : vector<16x384xf32>
    %10 = tpu.matmul %7, %9, %cst_9 {dimension_numbers = #tpu.dot_dimension_numbers<[1], [0], [0], [1], [0, 0, 1, 1], [], []>} : vector<16x384xf32>, vector<384x384xf32>, vector<16x384xf32> -> vector<16x384xf32>
    %c1 = arith.constant 1 : index
    %c0_10 = arith.constant 0 : index
    %11 = vector.load %arg5[%c1, %c0_10] : memref<8x384xf32, #tpu.memory_space<vmem>>, vector<1x384xf32>
    %12 = vector.broadcast %11 : vector<1x384xf32> to vector<16x384xf32>
    %13 = arith.addf %10, %12 : vector<16x384xf32>
    %cst_11 = arith.constant 0.000000e+00 : f32
    %14 = vector.broadcast %cst_11 : f32 to vector<16x384xf32>
    %15 = arith.maximumf %13, %14 : vector<16x384xf32>
    %c1_12 = arith.constant 1 : index
    %c0_13 = arith.constant 0 : index
    %c0_14 = arith.constant 0 : index
    %16 = vector.load %arg3[%c1_12, %c0_13, %c0_14] : memref<3x384x384xf32, #tpu.memory_space<vmem>>, vector<1x384x384xf32>
    %17 = vector.shape_cast %16 : vector<1x384x384xf32> to vector<384x384xf32>
    %cst_15 = arith.constant dense<0.000000e+00> : vector<16x384xf32>
    %18 = tpu.matmul %15, %17, %cst_15 {dimension_numbers = #tpu.dot_dimension_numbers<[1], [0], [0], [1], [0, 0, 1, 1], [], []>} : vector<16x384xf32>, vector<384x384xf32>, vector<16x384xf32> -> vector<16x384xf32>
    %c2 = arith.constant 2 : index
    %c0_16 = arith.constant 0 : index
    %19 = vector.load %arg5[%c2, %c0_16] : memref<8x384xf32, #tpu.memory_space<vmem>>, vector<1x384xf32>
    %20 = vector.broadcast %19 : vector<1x384xf32> to vector<16x384xf32>
    %21 = arith.addf %18, %20 : vector<16x384xf32>
    %cst_17 = arith.constant 0.000000e+00 : f32
    %22 = vector.broadcast %cst_17 : f32 to vector<16x384xf32>
    %23 = arith.maximumf %21, %22 : vector<16x384xf32>
    %c2_18 = arith.constant 2 : index
    %c0_19 = arith.constant 0 : index
    %c0_20 = arith.constant 0 : index
    %24 = vector.load %arg3[%c2_18, %c0_19, %c0_20] : memref<3x384x384xf32, #tpu.memory_space<vmem>>, vector<1x384x384xf32>
    %25 = vector.shape_cast %24 : vector<1x384x384xf32> to vector<384x384xf32>
    %cst_21 = arith.constant dense<0.000000e+00> : vector<16x384xf32>
    %26 = tpu.matmul %23, %25, %cst_21 {dimension_numbers = #tpu.dot_dimension_numbers<[1], [0], [0], [1], [0, 0, 1, 1], [], []>} : vector<16x384xf32>, vector<384x384xf32>, vector<16x384xf32> -> vector<16x384xf32>
    %c3 = arith.constant 3 : index
    %c0_22 = arith.constant 0 : index
    %27 = vector.load %arg5[%c3, %c0_22] : memref<8x384xf32, #tpu.memory_space<vmem>>, vector<1x384xf32>
    %28 = vector.broadcast %27 : vector<1x384xf32> to vector<16x384xf32>
    %29 = arith.addf %26, %28 : vector<16x384xf32>
    %cst_23 = arith.constant 0.000000e+00 : f32
    %30 = vector.broadcast %cst_23 : f32 to vector<16x384xf32>
    %31 = arith.maximumf %29, %30 : vector<16x384xf32>
    %c0_24 = arith.constant 0 : index
    %c0_25 = arith.constant 0 : index
    %32 = vector.load %arg4[%c0_24, %c0_25] : memref<384x128xf32, #tpu.memory_space<vmem>>, vector<384x128xf32>
    %cst_26 = arith.constant dense<0.000000e+00> : vector<16x128xf32>
    %33 = tpu.matmul %31, %32, %cst_26 {dimension_numbers = #tpu.dot_dimension_numbers<[1], [0], [0], [1], [0, 0, 1, 1], [], []>} : vector<16x384xf32>, vector<384x128xf32>, vector<16x128xf32> -> vector<16x128xf32>
    %c0_27 = arith.constant 0 : index
    %c0_28 = arith.constant 0 : index
    %34 = vector.load %arg6[%c0_27, %c0_28] : memref<8x128xf32, #tpu.memory_space<vmem>>, vector<1x128xf32>
    %35 = vector.broadcast %34 : vector<1x128xf32> to vector<16x128xf32>
    %36 = arith.addf %33, %35 : vector<16x128xf32>
    %c0_29 = arith.constant 0 : index
    %c0_30 = arith.constant 0 : index
    %37 = vector.load %arg7[%c0_29, %c0_30] : memref<16x128xf32, #tpu.memory_space<vmem>>, vector<16x128xf32>
    tpu.vector_store %arg7[%c0_29, %c0_30], %36 {strides = array<i32>} : memref<16x128xf32, #tpu.memory_space<vmem>>, vector<16x128xf32>,
    return
  }
  func.func @transform_0(%arg0: i32) -> (i32, i32) {
    %c0_i32 = arith.constant 0 : i32
    %c0_i32_0 = arith.constant 0 : i32
    return %arg0, %c0_i32 : i32, i32
  }
  func.func @transform_1(%arg0: i32) -> (i32, i32) {
    %c0_i32 = arith.constant 0 : i32
    %c0_i32_0 = arith.constant 0 : i32
    %c0_i32_1 = arith.constant 0 : i32
    return %c0_i32, %c0_i32_0 : i32, i32
  }
  func.func @transform_2(%arg0: i32) -> (i32, i32, i32) {
    %c0_i32 = arith.constant 0 : i32
    %c0_i32_0 = arith.constant 0 : i32
    %c0_i32_1 = arith.constant 0 : i32
    %c0_i32_2 = arith.constant 0 : i32
    return %c0_i32, %c0_i32_0, %c0_i32_1 : i32, i32, i32
  }
  func.func @transform_3(%arg0: i32) -> (i32, i32) {
    %c0_i32 = arith.constant 0 : i32
    %c0_i32_0 = arith.constant 0 : i32
    %c0_i32_1 = arith.constant 0 : i32
    return %c0_i32, %c0_i32_0 : i32, i32
  }
  func.func @transform_4(%arg0: i32) -> (i32, i32) {
    %c0_i32 = arith.constant 0 : i32
    %c0_i32_0 = arith.constant 0 : i32
    %c0_i32_1 = arith.constant 0 : i32
    return %c0_i32, %c0_i32_0 : i32, i32
  }
  func.func @transform_5(%arg0: i32) -> (i32, i32) {
    %c0_i32 = arith.constant 0 : i32
    %c0_i32_0 = arith.constant 0 : i32
    %c0_i32_1 = arith.constant 0 : i32
    return %c0_i32, %c0_i32_0 : i32, i32
  }
  func.func @transform_6(%arg0: i32) -> (i32, i32) {
    %c0_i32 = arith.constant 0 : i32
    %c0_i32_0 = arith.constant 0 : i32
    return %arg0, %c0_i32 : i32, i32
  }
}

</mosaic_0001>

<bundles_post_ra>
// kernel: mlp_deep_forward.1
= control target key start
LH: loop header
LB: loop body
LE: loop exit
PB: predicated region body
PF: predicated region fallthrough
CT: control target
= control target key end

     0   :  { %11 = vsyncpa [#allocation3], 0  ;;  %s2668_s0 = inlined_call_operand.vmem [shape: f32[16,128], index: 0, kind: input, shape index: {}]   ;;  %s2669_s1 = inlined_call_operand.hbm [shape: f32[128,384], index: 1, kind: input, shape index: {}]   ;;  %s2670_s2 = inlined_call_operand.hbm [shape: f32[3,384,384], index: 2, kind: input, shape index: {}]   ;;  %s2671_s3 = inlined_call_operand.hbm [shape: f32[384,128], index: 3, kind: input, shape index: {}]   ;;  %s2672_s4 = inlined_call_operand.hbm [shape: f32[8,384], index: 4, kind: input, shape index: {}]   ;;  %s2673_s5 = inlined_call_operand.hbm [shape: f32[8,128], index: 5, kind: input, shape index: {}]   ;;  %s2674_s6 = inlined_call_operand.vmem [shape: f32[16,128], index: 6, kind: output, shape index: {}]  }
   0x1   :  { %12 = vsyncpa [#allocation5], 0 }
   0x2   :  { %13 = vsyncpa [#allocation8], 0  ;;  %s2476_s21 = smov [#allocation4]   ;;  %s2477_s23 = smov [#allocation7]  }
   0x3   :  { %s33_s22 = sshll.u32 %s2476_s21, 4  ;;  %s58_s24 = sshll.u32 %s2477_s23, 4  ;;  %s34_s22 = int_to_ptr.vmem [resolvable:$true] %s33_s22  ;;  %s59_s24 = int_to_ptr.vmem [resolvable:$true] %s58_s24 }
   0x4   :  { %s2378_s25 = scalar_lea.vmem %s34_s22, 55296  ;;  %p2383_p1 = scmp.lt.s32.totalorder %s34_s22, %s34_s22 }
   0x5   :  { %p2379_p0 = scmp.ne.s32.totalorder %s34_s22, %s2378_s25  ;;  %p2384_p2 = scmp.lt.s32.totalorder %s2378_s25, %s2378_s25 }
   0x7   :  { %p2385_p3 = por %p2384_p2, %p2383_p1 }
   0x9   :  { %p2386_p4 = pnand %p2385_p3, %p2379_p0 }
   0xb   :  { %2389 = shalt.err (!%p2386_p4)
}
   0xc   :  { %s2478_s26 = smov 384   ;;  %s2479_s27 = smov 24  }
   0xd   :  { %39 = dma.hbm_to_vmem [thread:$0]  %s2670_s2, 55296, %s34_s22, [#allocation5], %s2478_s26, %s2478_s26, %s2479_s27  }
   0xe   :  { %s2398_s30 = scalar_lea.vmem %s59_s24, 384  ;;  %p2403_p6 = scmp.lt.s32.totalorder %s59_s24, %s59_s24 }
   0xf   :  { %p2399_p5 = scmp.ne.s32.totalorder %s59_s24, %s2398_s30  ;;  %p2404_p7 = scmp.lt.s32.totalorder %s2398_s30, %s2398_s30 }
  0x11   :  { %p2405_p8 = por %p2404_p7, %p2403_p6 }
  0x13   :  { %p2406_p9 = pnand %p2405_p8, %p2399_p5 }
  0x15   :  { %2409 = shalt.err (!%p2406_p9)
}
  0x16   :  { %61 = dma.hbm_to_vmem [thread:$0]  %s2672_s4, 384, %s59_s24, [#allocation8]  }
  0x17   :  { %s2480_s9 = smov [#allocation2]   ;;  %s2481_s11 = smov [#allocation6]  }
  0x18   :  { %s21_s10 = sshll.u32 %s2480_s9, 4  ;;  %s45_s12 = sshll.u32 %s2481_s11, 4  ;;  %s22_s10 = int_to_ptr.vmem [resolvable:$true] %s21_s10  ;;  %s46_s12 = int_to_ptr.vmem [resolvable:$true] %s45_s12 }
  0x19   :  { %s2418_s13 = scalar_lea.vmem %s22_s10, 6144  ;;  %p2423_p11 = scmp.lt.s32.totalorder %s22_s10, %s22_s10 }
  0x1a   :  { %p2419_p10 = scmp.ne.s32.totalorder %s22_s10, %s2418_s13  ;;  %p2424_p12 = scmp.lt.s32.totalorder %s2418_s13, %s2418_s13 }
  0x1c   :  { %p2425_p13 = por %p2424_p12, %p2423_p11 }
  0x1e   :  { %p2426_p0 = pnand %p2425_p13, %p2419_p10 }
  0x20   :  { %2429 = shalt.err (!%p2426_p0)
}
  0x21   :  { %27 = dma.hbm_to_vmem [thread:$0]  %s2669_s1, 6144, %s22_s10, [#allocation3], %s2478_s26, %s2478_s26, %s2479_s27  }
  0x22   :  { %s2438_s15 = scalar_lea.vmem %s46_s12, 6144  ;;  %p2443_p2 = scmp.lt.s32.totalorder %s46_s12, %s46_s12 }
  0x23   :  { %p2439_p1 = scmp.ne.s32.totalorder %s46_s12, %s2438_s15  ;;  %p2444_p3 = scmp.lt.s32.totalorder %s2438_s15, %s2438_s15 }
  0x25   :  { %p2445_p4 = por %p2444_p3, %p2443_p2 }
  0x27   :  { %p2446_p5 = pnand %p2445_p4, %p2439_p1 }
  0x29   :  { %2449 = shalt.err (!%p2446_p5)
}
  0x2a   :  { %s2482_s4 = smov 128   ;;  %s2483_s16 = smov 8  }
  0x2b   :  { %51 = dma.hbm_to_vmem [thread:$0]  %s2671_s3, 6144, %s46_s12, [#allocation5], %s2482_s4, %s2482_s4, %s2483_s16  }
  0x2c   :  { %s2484_s19 = smov [#allocation9]  }
  0x2d   :  { %s68_s20 = sshll.u32 %s2484_s19, 4  ;;  %s69_s20 = int_to_ptr.vmem [resolvable:$true] %s68_s20 }
  0x2e   :  { %s2458_s21 = scalar_lea.vmem %s69_s20, 128  ;;  %p2463_p7 = scmp.lt.s32.totalorder %s69_s20, %s69_s20 }
  0x2f   :  { %p2459_p6 = scmp.ne.s32.totalorder %s69_s20, %s2458_s21  ;;  %p2464_p8 = scmp.lt.s32.totalorder %s2458_s21, %s2458_s21 }
  0x31   :  { %p2465_p9 = por %p2464_p8, %p2463_p7 }
  0x33   :  { %p2466_p10 = pnand %p2465_p9, %p2459_p6 }
  0x35   :  { %2469 = shalt.err (!%p2466_p10)
}
  0x36   :  { %71 = dma.hbm_to_vmem [thread:$0]  %s2673_s5, 128, %s69_s20, [#allocation8]  }
  0x37   :  { %2470 = dma.done.wait [#allocation3], 6144  }
  0x38   :  { %2471 = vsyncadd [#allocation3], 4294961152 }
  0x39   :  { %2472 = dma.done.wait [#allocation5], 61440  }
  0x3a   :  { %2473 = vsyncadd [#allocation5], 4294905856 }
  0x3b   :  { %2474 = dma.done.wait [#allocation8], 512  }
  0x3c   :  { %2475 = vsyncadd [#allocation8], 4294966784  ;;  %v2485_v0 = vmov 0.0   ;;  %v135_v1 = vld [vmem:[#allocation2 + $0x170] sm:$0xff]  ;;  %v136_v2 = vld [vmem:[#allocation2 + $0x178] sm:$0xff] }
  0x3d   :  { %218 = vmatprep.mubr.f32.mxu0 %v2485_v0  ;;  %v134_v3 = vld [vmem:[#allocation2 + $0x168] sm:$0xff]  ;;  %154 = vmatprep.subr.mxu0 %v135_v1  ;;  %v132_v4 = vld [vmem:[#allocation2 + $0x158] sm:$0xff]  ;;  %v133_v5 = vld [vmem:[#allocation2 + $0x160] sm:$0xff] }
  0x3e   :  { %2185 = vmatprep.subr.mxu1 %v136_v2  ;;  %v131_v6 = vld [vmem:[#allocation2 + $0x150] sm:$0xff]  ;;  %155 = vmatpush1.msra.mxu0 %v134_v3  ;;  %v129_v7 = vld [vmem:[#allocation2 + $0x140] sm:$0xff]  ;;  %v130_v8 = vld [vmem:[#allocation2 + $0x148] sm:$0xff] }
  0x3f   :  { %2186 = vmatpush3.msra.mxu1 %v136_v2  ;;  %156 = vmatprep.subr.mxu0 %v132_v4  ;;  %v128_v9 = vld [vmem:[#allocation2 + $0x138] sm:$0xff]  ;;  %v126_v10 = vld [vmem:[#allocation2 + $0x128] sm:$0xff]  ;;  %v127_v11 = vld [vmem:[#allocation2 + $0x130] sm:$0xff] }
  0x40   :  { %2187 = vmatprep.subr.mxu1 %v133_v5  ;;  %157 = vmatpush1.msra.mxu0 %v131_v6  ;;  %v125_v12 = vld [vmem:[#allocation2 + $0x120] sm:$0xff]  ;;  %v123_v13 = vld [vmem:[#allocation2 + $0x110] sm:$0xff]  ;;  %v124_v14 = vld [vmem:[#allocation2 + $0x118] sm:$0xff] }
  0x41   :  { %2188 = vmatpush3.msra.mxu1 %v133_v5  ;;  %158 = vmatprep.subr.mxu0 %v129_v7  ;;  %v122_v15 = vld [vmem:[#allocation2 + $0x108] sm:$0xff]  ;;  %v120_v16 = vld [vmem:[#allocation2 + $0xf8] sm:$0xff]  ;;  %v121_v17 = vld [vmem:[#allocation2 + $0x100] sm:$0xff] }
  0x42   :  { %2189 = vmatprep.subr.mxu1 %v130_v8  ;;  %159 = vmatpush1.msra.mxu0 %v128_v9  ;;  %v119_v18 = vld [vmem:[#allocation2 + $0xf0] sm:$0xff]  ;;  %v117_v19 = vld [vmem:[#allocation2 + $0xe0] sm:$0xff]  ;;  %v118_v20 = vld [vmem:[#allocation2 + $0xe8] sm:$0xff] }
  0x43   :  { %2190 = vmatpush3.msra.mxu1 %v130_v8  ;;  %160 = vmatprep.subr.mxu0 %v126_v10  ;;  %v116_v21 = vld [vmem:[#allocation2 + $0xd8] sm:$0xff]  ;;  %v114_v22 = vld [vmem:[#allocation2 + $0xc8] sm:$0xff]  ;;  %v115_v23 = vld [vmem:[#allocation2 + $0xd0] sm:$0xff] }
  0x44   :  { %2191 = vmatprep.subr.mxu1 %v127_v11  ;;  %161 = vmatpush1.msra.mxu0 %v125_v12  ;;  %v113_v24 = vld [vmem:[#allocation2 + $0xc0] sm:$0xff]  ;;  %v111_v25 = vld [vmem:[#allocation2 + $0xb0] sm:$0xff]  ;;  %v112_v26 = vld [vmem:[#allocation2 + $0xb8] sm:$0xff] }
  0x45   :  { %2192 = vmatpush3.msra.mxu1 %v127_v11  ;;  %162 = vmatprep.subr.mxu0 %v123_v13  ;;  %v110_v27 = vld [vmem:[#allocation2 + $0xa8] sm:$0xff]  ;;  %v108_v28 = vld [vmem:[#allocation2 + $0x98] sm:$0xff]  ;;  %v109_v29 = vld [vmem:[#allocation2 + $0xa0] sm:$0xff] }
  0x46   :  { %2193 = vmatprep.subr.mxu1 %v124_v14  ;;  %163 = vmatpush1.msra.mxu0 %v122_v15  ;;  %v107_v30 = vld [vmem:[#allocation2 + $0x90] sm:$0xff]  ;;  %v105_v31 = vld [vmem:[#allocation2 + $0x80] sm:$0xff]  ;;  %v106_v32 = vld [vmem:[#allocation2 + $0x88] sm:$0xff] }
  0x47   :  { %2194 = vmatpush3.msra.mxu1 %v124_v14  ;;  %164 = vmatprep.subr.mxu0 %v120_v16  ;;  %v104_v33 = vld [vmem:[#allocation2 + $0x78] sm:$0xff]  ;;  %v102_v34 = vld [vmem:[#allocation2 + $0x68] sm:$0xff]  ;;  %v103_v35 = vld [vmem:[#allocation2 + $0x70] sm:$0xff] }
  0x48   :  { %2195 = vmatprep.subr.mxu1 %v121_v17  ;;  %165 = vmatpush1.msra.mxu0 %v119_v18  ;;  %v101_v36 = vld [vmem:[#allocation2 + $0x60] sm:$0xff]  ;;  %v99_v37 = vld [vmem:[#allocation2 + $0x50] sm:$0xff]  ;;  %v100_v38 = vld [vmem:[#allocation2 + $0x58] sm:$0xff] }
  0x49   :  { %2196 = vmatpush3.msra.mxu1 %v121_v17  ;;  %166 = vmatprep.subr.mxu0 %v117_v19  ;;  %v98_v39 = vld [vmem:[#allocation2 + $0x48] sm:$0xff]  ;;  %v96_v40 = vld [vmem:[#allocation2 + $0x38] sm:$0xff]  ;;  %v97_v41 = vld [vmem:[#allocation2 + $0x40] sm:$0xff] }
  0x4a   :  { %2197 = vmatprep.subr.mxu1 %v118_v20  ;;  %167 = vmatpush1.msra.mxu0 %v116_v21  ;;  %v95_v42 = vld [vmem:[#allocation2 + $0x30] sm:$0xff]  ;;  %v93_v43 = vld [vmem:[#allocation2 + $0x20] sm:$0xff]  ;;  %v94_v44 = vld [vmem:[#allocation2 + $0x28] sm:$0xff] }
  0x4b   :  { %2198 = vmatpush3.msra.mxu1 %v118_v20  ;;  %168 = vmatprep.subr.mxu0 %v114_v22  ;;  %v92_v45 = vld [vmem:[#allocation2 + $0x18] sm:$0xff]  ;;  %v90_v46 = vld [vmem:[#allocation2 + $0x8] sm:$0xff]  ;;  %v91_v47 = vld [vmem:[#allocation2 + $0x10] sm:$0xff] }
  0x4c   :  { %2199 = vmatprep.subr.mxu1 %v115_v23  ;;  %169 = vmatpush1.msra.mxu0 %v113_v24  ;;  %v89_v48 = vld [vmem:[#allocation2] sm:$0xff]  ;;  %v88_v50 = vld [vmem:[%s2668_s0 + $0x8] sm:$0xff]  ;;  %v358_v51 = vld [vmem:[#allocation4 + $0x170] sm:$0xff] }
  0x4d   :  { %2200 = vmatpush3.msra.mxu1 %v115_v23  ;;  %170 = vmatprep.subr.mxu0 %v111_v25  ;;  %v87_v49 = vld [vmem:[%s2668_s0] sm:$0xff]  ;;  %v454_v52 = vld [vmem:[#allocation4 + $0x470] sm:$0xff]  ;;  %v357_v53 = vld [vmem:[#allocation4 + $0x168] sm:$0xff] }
  0x4e   :  { %2201 = vmatprep.subr.mxu1 %v112_v26  ;;  %171 = vmatpush1.msra.mxu0 %v110_v27  ;;  %v453_v54 = vld [vmem:[#allocation4 + $0x468] sm:$0xff]  ;;  %v355_v55 = vld [vmem:[#allocation4 + $0x158] sm:$0xff]  ;;  %v354_v56 = vld [vmem:[#allocation4 + $0x150] sm:$0xff] }
  0x4f   :  { %2202 = vmatpush3.msra.mxu1 %v112_v26  ;;  %172 = vmatprep.subr.mxu0 %v108_v28  ;;  %v451_v57 = vld [vmem:[#allocation4 + $0x458] sm:$0xff]  ;;  %v352_v58 = vld [vmem:[#allocation4 + $0x140] sm:$0xff]  ;;  %v450_v59 = vld [vmem:[#allocation4 + $0x450] sm:$0xff] }
  0x50   :  { %2203 = vmatprep.subr.mxu1 %v109_v29  ;;  %173 = vmatpush1.msra.mxu0 %v107_v30  ;;  %v351_v60 = vld [vmem:[#allocation4 + $0x138] sm:$0xff]  ;;  %v448_v61 = vld [vmem:[#allocation4 + $0x440] sm:$0xff]  ;;  %v349_v62 = vld [vmem:[#allocation4 + $0x128] sm:$0xff] }
  0x51   :  { %2204 = vmatpush3.msra.mxu1 %v109_v29  ;;  %174 = vmatprep.subr.mxu0 %v105_v31  ;;  %v447_v63 = vld [vmem:[#allocation4 + $0x438] sm:$0xff]  ;;  %v348_v1 = vld [vmem:[#allocation4 + $0x120] sm:$0xff]  ;;  %v445_v2 = vld [vmem:[#allocation4 + $0x428] sm:$0xff] }
  0x52   :  { %2205 = vmatprep.subr.mxu1 %v106_v32  ;;  %175 = vmatpush1.msra.mxu0 %v104_v33  ;;  %v346_v3 = vld [vmem:[#allocation4 + $0x110] sm:$0xff]  ;;  %v444_v4 = vld [vmem:[#allocation4 + $0x420] sm:$0xff]  ;;  %v345_v5 = vld [vmem:[#allocation4 + $0x108] sm:$0xff] }
  0x53   :  { %2206 = vmatpush3.msra.mxu1 %v106_v32  ;;  %176 = vmatprep.subr.mxu0 %v102_v34  ;;  %v442_v6 = vld [vmem:[#allocation4 + $0x410] sm:$0xff]  ;;  %v343_v7 = vld [vmem:[#allocation4 + $0xf8] sm:$0xff]  ;;  %v441_v8 = vld [vmem:[#allocation4 + $0x408] sm:$0xff] }
  0x54   :  { %2207 = vmatprep.subr.mxu1 %v103_v35  ;;  %177 = vmatpush1.msra.mxu0 %v101_v36  ;;  %v342_v9 = vld [vmem:[#allocation4 + $0xf0] sm:$0xff]  ;;  %v439_v10 = vld [vmem:[#allocation4 + $0x3f8] sm:$0xff]  ;;  %v340_v11 = vld [vmem:[#allocation4 + $0xe0] sm:$0xff] }
  0x55   :  { %2208 = vmatpush3.msra.mxu1 %v103_v35  ;;  %178 = vmatprep.subr.mxu0 %v99_v37  ;;  %v438_v12 = vld [vmem:[#allocation4 + $0x3f0] sm:$0xff]  ;;  %v339_v13 = vld [vmem:[#allocation4 + $0xd8] sm:$0xff]  ;;  %v436_v14 = vld [vmem:[#allocation4 + $0x3e0] sm:$0xff] }
  0x56   :  { %2209 = vmatprep.subr.mxu1 %v100_v38  ;;  %179 = vmatpush1.msra.mxu0 %v98_v39  ;;  %v337_v15 = vld [vmem:[#allocation4 + $0xc8] sm:$0xff]  ;;  %v435_v16 = vld [vmem:[#allocation4 + $0x3d8] sm:$0xff]  ;;  %v336_v17 = vld [vmem:[#allocation4 + $0xc0] sm:$0xff] }
  0x57   :  { %2210 = vmatpush3.msra.mxu1 %v100_v38  ;;  %180 = vmatprep.subr.mxu0 %v96_v40  ;;  %v433_v18 = vld [vmem:[#allocation4 + $0x3c8] sm:$0xff]  ;;  %v334_v19 = vld [vmem:[#allocation4 + $0xb0] sm:$0xff]  ;;  %v432_v20 = vld [vmem:[#allocation4 + $0x3c0] sm:$0xff] }
  0x58   :  { %2211 = vmatprep.subr.mxu1 %v97_v41  ;;  %181 = vmatpush1.msra.mxu0 %v95_v42  ;;  %v333_v21 = vld [vmem:[#allocation4 + $0xa8] sm:$0xff]  ;;  %v430_v22 = vld [vmem:[#allocation4 + $0x3b0] sm:$0xff]  ;;  %v331_v23 = vld [vmem:[#allocation4 + $0x98] sm:$0xff] }
  0x59   :  { %2212 = vmatpush3.msra.mxu1 %v97_v41  ;;  %182 = vmatprep.subr.mxu0 %v93_v43  ;;  %v429_v24 = vld [vmem:[#allocation4 + $0x3a8] sm:$0xff]  ;;  %v330_v25 = vld [vmem:[#allocation4 + $0x90] sm:$0xff]  ;;  %v427_v26 = vld [vmem:[#allocation4 + $0x398] sm:$0xff] }
  0x5a   :  { %2213 = vmatprep.subr.mxu1 %v94_v44  ;;  %183 = vmatpush1.msra.mxu0 %v92_v45  ;;  %v328_v27 = vld [vmem:[#allocation4 + $0x80] sm:$0xff]  ;;  %v426_v28 = vld [vmem:[#allocation4 + $0x390] sm:$0xff]  ;;  %v327_v29 = vld [vmem:[#allocation4 + $0x78] sm:$0xff] }
  0x5b   :  { %2214 = vmatpush3.msra.mxu1 %v94_v44  ;;  %184 = vmatprep.subr.mxu0 %v90_v46  ;;  %v424_v30 = vld [vmem:[#allocation4 + $0x380] sm:$0xff]  ;;  %v325_v31 = vld [vmem:[#allocation4 + $0x68] sm:$0xff]  ;;  %v423_v32 = vld [vmem:[#allocation4 + $0x378] sm:$0xff] }
  0x5c   :  { %2215 = vmatprep.subr.mxu1 %v91_v47  ;;  %185 = vmatpush1.msra.mxu0 %v89_v48  ;;  %v324_v33 = vld [vmem:[#allocation4 + $0x60] sm:$0xff]  ;;  %v421_v34 = vld [vmem:[#allocation4 + $0x368] sm:$0xff]  ;;  %v322_v35 = vld [vmem:[#allocation4 + $0x50] sm:$0xff] }
  0x5d   :  { %2216 = vmatpush3.msra.mxu1 %v91_v47  ;;  %2217 = vmatprep.mubr.f32.mxu1 %v87_v49  ;;  %v420_v36 = vld [vmem:[#allocation4 + $0x360] sm:$0xff]  ;;  %v321_v37 = vld [vmem:[#allocation4 + $0x48] sm:$0xff]  ;;  %v418_v38 = vld [vmem:[#allocation4 + $0x350] sm:$0xff] }
  0x5e   :  { %219 = vmatmul.mubr.f32.vlgmr.msra.gmra.mxu0 %v87_v49  ;;  %2218 = vmatmul.mubr.f32.vlgmr.msra.gmra.mxu1 %v88_v50  ;;  %v319_v39 = vld [vmem:[#allocation4 + $0x38] sm:$0xff]  ;;  %v417_v40 = vld [vmem:[#allocation4 + $0x348] sm:$0xff]  ;;  %v318_v41 = vld [vmem:[#allocation4 + $0x30] sm:$0xff] }
  0x5f   :  { %224 = vmatprep.mubr.f32.mxu0 %v2485_v0  ;;  %474 = vmatprep.subr.mxu0 %v358_v51  ;;  %v316_v42 = vld [vmem:[#allocation4 + $0x20] sm:$0xff]  ;;  %v315_v43 = vld [vmem:[#allocation4 + $0x18] sm:$0xff]  ;;  %v313_v44 = vld [vmem:[#allocation4 + $0x8] sm:$0xff] }
  0x60   :  { %551 = vmatprep.subr.mxu1 %v454_v52  ;;  %475 = vmatpush1.msra.mxu0 %v357_v53  ;;  %v312_v45 = vld [vmem:[#allocation4] sm:$0xff]  ;;  %v406_v46 = vld [vmem:[#allocation4 + $0x2f0] sm:$0xff]  ;;  %v405_v47 = vld [vmem:[#allocation4 + $0x2e8] sm:$0xff] }
  0x61   :  { %552 = vmatpush1.msra.mxu1 %v453_v54  ;;  %476 = vmatprep.subr.mxu0 %v355_v55  ;;  %v403_v48 = vld [vmem:[#allocation4 + $0x2d8] sm:$0xff]  ;;  %v402_v49 = vld [vmem:[#allocation4 + $0x2d0] sm:$0xff]  ;;  %v397_v52 = vld [vmem:[#allocation4 + $0x2a8] sm:$0xff] }
  0x62   :  { %225 = vmatmul.mubr.f32.gmra.mxu0 %v88_v50  ;;  %553 = vmatprep.subr.mxu1 %v451_v57  ;;  %v400_v50 = vld [vmem:[#allocation4 + $0x2c0] sm:$0xff]  ;;  %v399_v51 = vld [vmem:[#allocation4 + $0x2b8] sm:$0xff]  ;;  %v394_v54 = vld [vmem:[#allocation4 + $0x290] sm:$0xff] }
  0x63   :  { %477 = vmatpush1.msra.mxu0 %v354_v56  ;;  %554 = vmatpush1.msra.mxu1 %v450_v59  ;;  %v396_v53 = vld [vmem:[#allocation4 + $0x2a0] sm:$0xff]  ;;  %v393_v55 = vld [vmem:[#allocation4 + $0x288] sm:$0xff]  ;;  %v391_v56 = vld [vmem:[#allocation4 + $0x278] sm:$0xff] }
  0x64   :  { %478 = vmatprep.subr.mxu0 %v352_v58  ;;  %555 = vmatprep.subr.mxu1 %v448_v61  ;;  %v390_v57 = vld [vmem:[#allocation4 + $0x270] sm:$0xff]  ;;  %v388_v58 = vld [vmem:[#allocation4 + $0x260] sm:$0xff]  ;;  %v387_v59 = vld [vmem:[#allocation4 + $0x258] sm:$0xff] }
  0x65   :  { %479 = vmatpush1.msra.mxu0 %v351_v60  ;;  %556 = vmatpush1.msra.mxu1 %v447_v63  ;;  %v385_v60 = vld [vmem:[#allocation4 + $0x248] sm:$0xff]  ;;  %v384_v61 = vld [vmem:[#allocation4 + $0x240] sm:$0xff] }
  0x66   :  { %480 = vmatprep.subr.mxu0 %v349_v62  ;;  %557 = vmatprep.subr.mxu1 %v445_v2  ;;  %v382_v62 = vld [vmem:[#allocation4 + $0x230] sm:$0xff]  ;;  %v381_v63 = vld [vmem:[#allocation4 + $0x228] sm:$0xff] }
  0x67   :  { %481 = vmatpush1.msra.mxu0 %v348_v1  ;;  %558 = vmatpush1.msra.mxu1 %v444_v4  ;;  %v379_v1 = vld [vmem:[#allocation4 + $0x218] sm:$0xff]  ;;  %v378_v2 = vld [vmem:[#allocation4 + $0x210] sm:$0xff] }
  0x68   :  { %482 = vmatprep.subr.mxu0 %v346_v3  ;;  %559 = vmatprep.subr.mxu1 %v442_v6  ;;  %v376_v3 = vld [vmem:[#allocation4 + $0x200] sm:$0xff]  ;;  %v375_v4 = vld [vmem:[#allocation4 + $0x1f8] sm:$0xff] }
  0x69   :  { %483 = vmatpush1.msra.mxu0 %v345_v5  ;;  %560 = vmatpush1.msra.mxu1 %v441_v8  ;;  %v373_v5 = vld [vmem:[#allocation4 + $0x1e8] sm:$0xff]  ;;  %v372_v6 = vld [vmem:[#allocation4 + $0x1e0] sm:$0xff] }
  0x6a   :  { %484 = vmatprep.subr.mxu0 %v343_v7  ;;  %561 = vmatprep.subr.mxu1 %v439_v10  ;;  %v370_v7 = vld [vmem:[#allocation4 + $0x1d0] sm:$0xff]  ;;  %v369_v8 = vld [vmem:[#allocation4 + $0x1c8] sm:$0xff]  ;;  %v367_v10 = vld [vmem:[#allocation4 + $0x1b8] sm:$0xff] }
  0x6b   :  { %485 = vmatpush1.msra.mxu0 %v342_v9  ;;  %562 = vmatpush1.msra.mxu1 %v438_v12  ;;  %v415_v9 = vld [vmem:[#allocation4 + $0x338] sm:$0xff]  ;;  %v366_v12 = vld [vmem:[#allocation4 + $0x1b0] sm:$0xff] }
  0x6c   :  { %486 = vmatprep.subr.mxu0 %v340_v11  ;;  %563 = vmatprep.subr.mxu1 %v436_v14  ;;  %v414_v11 = vld [vmem:[#allocation4 + $0x330] sm:$0xff]  ;;  %v364_v14 = vld [vmem:[#allocation4 + $0x1a0] sm:$0xff] }
  0x6d   :  { %487 = vmatpush1.msra.mxu0 %v339_v13  ;;  %564 = vmatpush1.msra.mxu1 %v435_v16  ;;  %v412_v13 = vld [vmem:[#allocation4 + $0x320] sm:$0xff]  ;;  %v363_v16 = vld [vmem:[#allocation4 + $0x198] sm:$0xff] }
  0x6e   :  { %488 = vmatprep.subr.mxu0 %v337_v15  ;;  %565 = vmatprep.subr.mxu1 %v433_v18  ;;  %v411_v15 = vld [vmem:[#allocation4 + $0x318] sm:$0xff]  ;;  %v361_v18 = vld [vmem:[#allocation4 + $0x188] sm:$0xff] }
  0x6f   :  { %489 = vmatpush1.msra.mxu0 %v336_v17  ;;  %566 = vmatpush1.msra.mxu1 %v432_v20  ;;  %v409_v17 = vld [vmem:[#allocation4 + $0x308] sm:$0xff]  ;;  %v360_v20 = vld [vmem:[#allocation4 + $0x180] sm:$0xff] }
  0x70   :  { %490 = vmatprep.subr.mxu0 %v334_v19  ;;  %567 = vmatprep.subr.mxu1 %v430_v22  ;;  %v408_v19 = vld [vmem:[#allocation4 + $0x300] sm:$0xff]  ;;  %v455_v22 = vld [vmem:[#allocation4 + $0x478] sm:$0xff] }
  0x71   :  { %491 = vmatpush1.msra.mxu0 %v333_v21  ;;  %568 = vmatpush1.msra.mxu1 %v429_v24  ;;  %v407_v21 = vld [vmem:[#allocation4 + $0x2f8] sm:$0xff] }
  0x72   :  { %492 = vmatprep.subr.mxu0 %v331_v23  ;;  %569 = vmatprep.subr.mxu1 %v427_v26  ;;  %v139_v23 = vlaneseq }
  0x73   :  { %493 = vmatpush1.msra.mxu0 %v330_v25  ;;  %570 = vmatpush1.msra.mxu1 %v426_v28 }
  0x74   :  { %494 = vmatprep.subr.mxu0 %v328_v27  ;;  %571 = vmatprep.subr.mxu1 %v424_v30  ;;  %v140_v24 = vshrl.u32 %v139_v23, 7  ;;  %v137_v27 = vld [vmem:[#allocation7] ss:$8 sm:$0x7]  ;;  %v419_v23 = vld [vmem:[#allocation4 + $0x358] sm:$0xff] }
  0x75   :  { %495 = vmatpush1.msra.mxu0 %v327_v29  ;;  %572 = vmatpush1.msra.mxu1 %v423_v32 }
  0x76   :  { %496 = vmatprep.subr.mxu0 %v325_v31  ;;  %573 = vmatprep.subr.mxu1 %v421_v34  ;;  %v2545_v25 = vsub.s32 0, %v140_v24  ;;  %v2547_v26 = vsub.s32 1, %v140_v24  ;;  %v2550_v29 = vsub.s32 2, %v140_v24  ;;  %v368_v24 = vld [vmem:[#allocation4 + $0x1c0] sm:$0xff] }
  0x77   :  { %497 = vmatpush1.msra.mxu0 %v324_v33  ;;  %574 = vmatpush1.msra.mxu1 %v420_v36 }
  0x78   :  { %498 = vmatprep.subr.mxu0 %v322_v35  ;;  %575 = vmatprep.subr.mxu1 %v418_v38  ;;  %v142_v28 = vrot.slane %v137_v27, %v2545_v25  ;;  %v146_v30 = vrot.slane %v137_v27, %v2547_v26  ;;  %v150_v34 = vrot.slane %v137_v27, %v2550_v29  ;;  %v320_v27 = vld [vmem:[#allocation4 + $0x40] sm:$0xff] }
  0x79   :  { %499 = vmatpush1.msra.mxu0 %v321_v37  ;;  %576 = vmatpush1.msra.mxu1 %v417_v40 }
  0x7a   :  { %500 = vmatprep.subr.mxu0 %v319_v39  ;;  %615 = vmatprep.mubr.f32.mxu1 %v2485_v0 }
  0x7b   :  { %501 = vmatpush1.msra.mxu0 %v318_v41  ;;  %577 = vmatprep.subr.mxu1 %v415_v9  ;;  %v383_v9 = vld [vmem:[#allocation4 + $0x238] sm:$0xff] }
  0x7c   :  { %502 = vmatprep.subr.mxu0 %v316_v42  ;;  %578 = vmatpush1.msra.mxu1 %v414_v11  ;;  %v431_v11 = vld [vmem:[#allocation4 + $0x3b8] sm:$0xff] }
  0x7d   :  { %503 = vmatpush1.msra.mxu0 %v315_v43  ;;  %579 = vmatprep.subr.mxu1 %v412_v13  ;;  %v332_v13 = vld [vmem:[#allocation4 + $0xa0] sm:$0xff] }
  0x7e   :  { %504 = vmatprep.subr.mxu0 %v313_v44  ;;  %580 = vmatpush1.msra.mxu1 %v411_v15  ;;  %v359_v44 = vld [vmem:[#allocation4 + $0x178] sm:$0xff]  ;;  %v377_v15 = vld [vmem:[#allocation4 + $0x208] sm:$0xff] }
  0x7f   :  { %505 = vmatpush1.msra.mxu0 %v312_v45  ;;  %581 = vmatprep.subr.mxu1 %v409_v17  ;;  %v425_v17 = vld [vmem:[#allocation4 + $0x388] sm:$0xff] }
  0x80   :  { %506 = vmatprep.subr.mxu0 %v406_v46  ;;  %582 = vmatpush1.msra.mxu1 %v408_v19  ;;  %v326_v19 = vld [vmem:[#allocation4 + $0x70] sm:$0xff] }
  0x81   :  { %507 = vmatpush2.msra.mxu0 %v405_v47  ;;  %1961 = vmatprep.subr.mxu1 %v407_v21  ;;  %v371_v21 = vld [vmem:[#allocation4 + $0x1d8] sm:$0xff] }
  0x82   :  { %508 = vmatprep.subr.mxu0 %v403_v48  ;;  %v404_v48 = vld [vmem:[#allocation4 + $0x2e0] sm:$0xff] }
  0x83   :  { %509 = vmatpush2.msra.mxu0 %v402_v49  ;;  %v452_v49 = vld [vmem:[#allocation4 + $0x460] sm:$0xff] }
  0x84   :  { %510 = vmatprep.subr.mxu0 %v400_v50  ;;  %v356_v50 = vld [vmem:[#allocation4 + $0x160] sm:$0xff] }
  0x85   :  { %511 = vmatpush2.msra.mxu0 %v399_v51 }
  0x86   :  { %512 = vmatprep.subr.mxu0 %v397_v52  ;;  %v401_v52 = vld [vmem:[#allocation4 + $0x2c8] sm:$0xff] }
  0x87   :  { %513 = vmatpush2.msra.mxu0 %v396_v53 }
  0x88   :  { %514 = vmatprep.subr.mxu0 %v394_v54 }
  0x89   :  { %515 = vmatpush2.msra.mxu0 %v393_v55  ;;  %v353_v55 = vld [vmem:[#allocation4 + $0x148] sm:$0xff] }
  0x8a   :  { %516 = vmatprep.subr.mxu0 %v391_v56  ;;  %v449_v56 = vld [vmem:[#allocation4 + $0x448] sm:$0xff] }
  0x8b   :  { %517 = vmatpush2.msra.mxu0 %v390_v57  ;;  %v398_v57 = vld [vmem:[#allocation4 + $0x2b0] sm:$0xff] }
  0x8c   :  { %518 = vmatprep.subr.mxu0 %v388_v58  ;;  %v350_v58 = vld [vmem:[#allocation4 + $0x130] sm:$0xff] }
  0x8d   :  { %519 = vmatpush2.msra.mxu0 %v387_v59  ;;  %v446_v59 = vld [vmem:[#allocation4 + $0x430] sm:$0xff] }
  0x8e   :  { %520 = vmatprep.subr.mxu0 %v385_v60  ;;  %v395_v60 = vld [vmem:[#allocation4 + $0x298] sm:$0xff] }
  0x8f   :  { %521 = vmatpush2.msra.mxu0 %v384_v61  ;;  %v347_v61 = vld [vmem:[#allocation4 + $0x118] sm:$0xff] }
  0x90   :  { %522 = vmatprep.subr.mxu0 %v382_v62  ;;  %v443_v62 = vld [vmem:[#allocation4 + $0x418] sm:$0xff] }
  0x91   :  { %523 = vmatpush2.msra.mxu0 %v381_v63  ;;  %v392_v63 = vld [vmem:[#allocation4 + $0x280] sm:$0xff] }
  0x92   :  { %524 = vmatprep.subr.mxu0 %v379_v1  ;;  %v344_v1 = vld [vmem:[#allocation4 + $0x100] sm:$0xff] }
  0x93   :  { %525 = vmatpush2.msra.mxu0 %v378_v2  ;;  %v440_v2 = vld [vmem:[#allocation4 + $0x400] sm:$0xff] }
  0x94   :  { %526 = vmatprep.subr.mxu0 %v376_v3  ;;  %v389_v3 = vld [vmem:[#allocation4 + $0x268] sm:$0xff] }
  0x95   :  { %527 = vmatpush2.msra.mxu0 %v375_v4  ;;  %v341_v4 = vld [vmem:[#allocation4 + $0xe8] sm:$0xff] }
  0x96   :  { %528 = vmatprep.subr.mxu0 %v373_v5  ;;  %v437_v5 = vld [vmem:[#allocation4 + $0x3e8] sm:$0xff] }
  0x97   :  { %529 = vmatpush2.msra.mxu0 %v372_v6  ;;  %v386_v6 = vld [vmem:[#allocation4 + $0x250] sm:$0xff] }
  0x98   :  { %530 = vmatprep.subr.mxu0 %v370_v7  ;;  %v338_v7 = vld [vmem:[#allocation4 + $0xd0] sm:$0xff] }
  0x99   :  { %531 = vmatpush2.msra.mxu0 %v369_v8  ;;  %v434_v8 = vld [vmem:[#allocation4 + $0x3d0] sm:$0xff] }
  0x9a   :  { %532 = vmatprep.subr.mxu0 %v367_v10  ;;  %v335_v10 = vld [vmem:[#allocation4 + $0xb8] sm:$0xff] }
  0x9b   :  { %533 = vmatpush2.msra.mxu0 %v366_v12  ;;  %v380_v12 = vld [vmem:[#allocation4 + $0x220] sm:$0xff] }
  0x9c   :  { %534 = vmatprep.subr.mxu0 %v364_v14  ;;  %v428_v14 = vld [vmem:[#allocation4 + $0x3a0] sm:$0xff] }
  0x9d   :  { %535 = vmatpush2.msra.mxu0 %v363_v16  ;;  %v329_v16 = vld [vmem:[#allocation4 + $0x88] sm:$0xff] }
  0x9e   :  { %536 = vmatprep.subr.mxu0 %v361_v18  ;;  %v374_v18 = vld [vmem:[#allocation4 + $0x1f0] sm:$0xff] }
  0x9f   :  { %537 = vmatpush2.msra.mxu0 %v360_v20  ;;  %v422_v20 = vld [vmem:[#allocation4 + $0x370] sm:$0xff] }
  0xa0   :  { %2220 = vmatprep.subr.mxu0 %v455_v22 }
 0x11e   :  { %v220_v31 = vpop.f32.mrf.mxu0  ;;  %v2219_v33 = vpop.f32.mrf.mxu1 }
 0x11f   :  { %v2553_v32 = vadd.f32 %v220_v31, %v142_v28  ;;  %v2557_v45 = vadd.f32 %v2219_v33, %v150_v34  ;;  %v317_v31 = vld [vmem:[#allocation4 + $0x28] sm:$0xff] }
 0x120   :  { %v222_v35 = vpop.f32.mrf.mxu0  ;;  %v297_v37 = vpop.f32.mrf.mxu1  ;;  %v413_v33 = vld [vmem:[#allocation4 + $0x328] sm:$0xff] }
 0x121   :  { %v223_v36 = vadd.f32 %v222_v35, %v146_v30  ;;  %v306_v38 = vmax.f32 %v2553_v32, 0.0  ;;  %v298_v39 = vadd.f32 %v297_v37, %v150_v34  ;;  %v311_v53 = vmax.f32 %v2557_v45, 0.0  ;;  %v362_v34 = vld [vmem:[#allocation4 + $0x190] sm:$0xff]  ;;  %v824_v32 = vld [vmem:[#allocation4 + $0x5b8] sm:$0xff]  ;;  %v818_v45 = vld [vmem:[#allocation4 + $0x588] sm:$0xff] }
 0x122   :  { %v226_v40 = vpop.f32.mrf.mxu0  ;;  %v314_v35 = vld [vmem:[#allocation4 + $0x10] sm:$0xff] }
 0x123   :  { %v307_v41 = vmax.f32 %v223_v36, 0.0  ;;  %v308_v42 = vmax.f32 %v298_v39, 0.0  ;;  %v2559_v46 = vadd.f32 %v226_v40, %v142_v28  ;;  %v416_v28 = vld [vmem:[#allocation4 + $0x340] sm:$0xff]  ;;  %v410_v36 = vld [vmem:[#allocation4 + $0x310] sm:$0xff]  ;;  %v830_v39 = vld [vmem:[#allocation4 + $0x5e8] sm:$0xff] }
 0x124   :  { %v228_v43 = vpop.f32.mrf.mxu0  ;;  %v831_v37 = vld [vmem:[#allocation4 + $0x5f0] sm:$0xff]  ;;  %v828_v40 = vld [vmem:[#allocation4 + $0x5d8] sm:$0xff] }
 0x125   :  { %v2561_v47 = vadd.f32 %v228_v43, %v146_v30  ;;  %538 = vmatprep.mubr.f32.mxu0 %v307_v41  ;;  %616 = vmatmul.mubr.f32.vlgmr.msra.gmra.mxu1 %v308_v42  ;;  %v309_v54 = vmax.f32 %v2559_v46, 0.0  ;;  %v365_v30 = vld [vmem:[#allocation4 + $0x1a8] sm:$0xff]  ;;  %v821_v43 = vld [vmem:[#allocation4 + $0x5a0] sm:$0xff] }
 0x126   :  { %539 = vmatmul.mubr.f32.vlgmr.msra.gmra.mxu0 %v306_v38  ;;  %1962 = vmatpush3.msra.mxu1 %v359_v44  ;;  %v819_v44 = vld [vmem:[#allocation4 + $0x590] sm:$0xff]  ;;  %v810_v46 = vld [vmem:[#allocation4 + $0x548] sm:$0xff] }
 0x127   :  { %v310_v51 = vmax.f32 %v2561_v47, 0.0  ;;  %2221 = vmatpush3.msra.mxu0 %v455_v22  ;;  %1963 = vmatprep.subr.mxu1 %v404_v48  ;;  %v323_v22 = vld [vmem:[#allocation4 + $0x58] sm:$0xff]  ;;  %v815_v48 = vld [vmem:[#allocation4 + $0x570] sm:$0xff] }
 0x128   :  { %2222 = vmatprep.subr.mxu0 %v452_v49  ;;  %1964 = vmatpush3.msra.mxu1 %v356_v50  ;;  %v816_v47 = vld [vmem:[#allocation4 + $0x578] sm:$0xff] }
 0x129   :  { %621 = vmatprep.mubr.f32.mxu1 %v2485_v0  ;;  %1965 = vmatprep.subr.mxu1 %v401_v52  ;;  %v812_v50 = vld [vmem:[#allocation4 + $0x558] sm:$0xff]  ;;  %v807_v52 = vld [vmem:[#allocation4 + $0x530] sm:$0xff] }
 0x12a   :  { %2223 = vmatpush3.msra.mxu0 %v452_v49  ;;  %544 = vmatprep.mubr.f32.mxu0 %v310_v51  ;;  %v813_v49 = vld [vmem:[#allocation4 + $0x560] sm:$0xff] }
 0x12b   :  { %622 = vmatmul.mubr.f32.gmra.mxu1 %v311_v53  ;;  %2224 = vmatprep.subr.mxu0 %v449_v56 }
 0x12c   :  { %1966 = vmatpush3.msra.mxu1 %v353_v55  ;;  %545 = vmatmul.mubr.f32.gmra.mxu0 %v309_v54  ;;  %v803_v55 = vld [vmem:[#allocation4 + $0x510] sm:$0xff] }
 0x12d   :  { %1967 = vmatprep.subr.mxu1 %v398_v57  ;;  %692 = vmatprep.mubr.f32.mxu1 %v307_v41  ;;  %v827_v41 = vld [vmem:[#allocation4 + $0x5d0] sm:$0xff]  ;;  %v800_v57 = vld [vmem:[#allocation4 + $0x4f8] sm:$0xff] }
 0x12e   :  { %2225 = vmatpush3.msra.mxu0 %v449_v56  ;;  %1968 = vmatpush3.msra.mxu1 %v350_v58  ;;  %v801_v56 = vld [vmem:[#allocation4 + $0x500] sm:$0xff]  ;;  %v798_v58 = vld [vmem:[#allocation4 + $0x4e8] sm:$0xff] }
 0x12f   :  { %2226 = vmatprep.subr.mxu0 %v446_v59  ;;  %2252 = vmatprep.mubr.f32.mxu0 %v308_v42  ;;  %v825_v42 = vld [vmem:[#allocation4 + $0x5c0] sm:$0xff] }
 0x130   :  { %1969 = vmatprep.subr.mxu1 %v395_v60  ;;  %2227 = vmatpush3.msra.mxu0 %v446_v59  ;;  %v797_v59 = vld [vmem:[#allocation4 + $0x4e0] sm:$0xff]  ;;  %v795_v60 = vld [vmem:[#allocation4 + $0x4d0] sm:$0xff] }
 0x131   :  { %1970 = vmatpush3.msra.mxu1 %v347_v61  ;;  %2228 = vmatprep.subr.mxu0 %v443_v62  ;;  %v794_v61 = vld [vmem:[#allocation4 + $0x4c8] sm:$0xff] }
 0x132   :  { %1971 = vmatprep.subr.mxu1 %v392_v63  ;;  %2229 = vmatpush3.msra.mxu0 %v443_v62  ;;  %v792_v62 = vld [vmem:[#allocation4 + $0x4b8] sm:$0xff]  ;;  %v791_v63 = vld [vmem:[#allocation4 + $0x4b0] sm:$0xff] }
 0x133   :  { %1972 = vmatpush3.msra.mxu1 %v344_v1  ;;  %2230 = vmatprep.subr.mxu0 %v440_v2  ;;  %v789_v1 = vld [vmem:[#allocation4 + $0x4a0] sm:$0xff] }
 0x134   :  { %1973 = vmatprep.subr.mxu1 %v389_v3  ;;  %2231 = vmatpush3.msra.mxu0 %v440_v2  ;;  %v788_v2 = vld [vmem:[#allocation4 + $0x498] sm:$0xff]  ;;  %v786_v3 = vld [vmem:[#allocation4 + $0x488] sm:$0xff] }
 0x135   :  { %1974 = vmatpush3.msra.mxu1 %v341_v4  ;;  %2232 = vmatprep.subr.mxu0 %v437_v5  ;;  %v785_v4 = vld [vmem:[#allocation4 + $0x480] sm:$0xff] }
 0x136   :  { %1975 = vmatprep.subr.mxu1 %v386_v6  ;;  %2233 = vmatpush3.msra.mxu0 %v437_v5  ;;  %v879_v5 = vld [vmem:[#allocation4 + $0x770] sm:$0xff]  ;;  %v878_v6 = vld [vmem:[#allocation4 + $0x768] sm:$0xff] }
 0x137   :  { %1976 = vmatpush3.msra.mxu1 %v338_v7  ;;  %2234 = vmatprep.subr.mxu0 %v434_v8  ;;  %v876_v7 = vld [vmem:[#allocation4 + $0x758] sm:$0xff] }
 0x138   :  { %1977 = vmatprep.subr.mxu1 %v383_v9  ;;  %2235 = vmatpush3.msra.mxu0 %v434_v8  ;;  %v875_v8 = vld [vmem:[#allocation4 + $0x750] sm:$0xff]  ;;  %v873_v9 = vld [vmem:[#allocation4 + $0x740] sm:$0xff] }
 0x139   :  { %1978 = vmatpush3.msra.mxu1 %v335_v10  ;;  %2236 = vmatprep.subr.mxu0 %v431_v11  ;;  %v872_v10 = vld [vmem:[#allocation4 + $0x738] sm:$0xff] }
 0x13a   :  { %1979 = vmatprep.subr.mxu1 %v380_v12  ;;  %2237 = vmatpush3.msra.mxu0 %v431_v11  ;;  %v870_v11 = vld [vmem:[#allocation4 + $0x728] sm:$0xff]  ;;  %v869_v12 = vld [vmem:[#allocation4 + $0x720] sm:$0xff] }
 0x13b   :  { %1980 = vmatpush3.msra.mxu1 %v332_v13  ;;  %2238 = vmatprep.subr.mxu0 %v428_v14  ;;  %v867_v13 = vld [vmem:[#allocation4 + $0x710] sm:$0xff] }
 0x13c   :  { %1981 = vmatprep.subr.mxu1 %v377_v15  ;;  %2239 = vmatpush3.msra.mxu0 %v428_v14  ;;  %v866_v14 = vld [vmem:[#allocation4 + $0x708] sm:$0xff]  ;;  %v864_v15 = vld [vmem:[#allocation4 + $0x6f8] sm:$0xff] }
 0x13d   :  { %1982 = vmatpush3.msra.mxu1 %v329_v16  ;;  %2240 = vmatprep.subr.mxu0 %v425_v17  ;;  %v863_v16 = vld [vmem:[#allocation4 + $0x6f0] sm:$0xff] }
 0x13e   :  { %1983 = vmatprep.subr.mxu1 %v374_v18  ;;  %2241 = vmatpush3.msra.mxu0 %v425_v17  ;;  %v927_v17 = vld [vmem:[#allocation4 + $0x8f0] sm:$0xff]  ;;  %v861_v18 = vld [vmem:[#allocation4 + $0x6e0] sm:$0xff] }
 0x13f   :  { %1984 = vmatpush3.msra.mxu1 %v326_v19  ;;  %2242 = vmatprep.subr.mxu0 %v422_v20  ;;  %v860_v19 = vld [vmem:[#allocation4 + $0x6d8] sm:$0xff] }
 0x140   :  { %1985 = vmatprep.subr.mxu1 %v371_v21  ;;  %2243 = vmatpush3.msra.mxu0 %v422_v20  ;;  %v926_v20 = vld [vmem:[#allocation4 + $0x8e8] sm:$0xff]  ;;  %v924_v21 = vld [vmem:[#allocation4 + $0x8d8] sm:$0xff] }
 0x141   :  { %1986 = vmatpush3.msra.mxu1 %v323_v22  ;;  %2244 = vmatprep.subr.mxu0 %v419_v23  ;;  %v923_v22 = vld [vmem:[#allocation4 + $0x8d0] sm:$0xff] }
 0x142   :  { %1987 = vmatprep.subr.mxu1 %v368_v24  ;;  %2245 = vmatpush3.msra.mxu0 %v419_v23  ;;  %v921_v23 = vld [vmem:[#allocation4 + $0x8c0] sm:$0xff]  ;;  %v858_v24 = vld [vmem:[#allocation4 + $0x6c8] sm:$0xff] }
 0x143   :  { %1988 = vmatpush3.msra.mxu1 %v320_v27  ;;  %2246 = vmatprep.subr.mxu0 %v416_v28  ;;  %v857_v27 = vld [vmem:[#allocation4 + $0x6c0] sm:$0xff] }
 0x144   :  { %1989 = vmatprep.subr.mxu1 %v365_v30  ;;  %2247 = vmatpush3.msra.mxu0 %v416_v28  ;;  %v920_v28 = vld [vmem:[#allocation4 + $0x8b8] sm:$0xff]  ;;  %v855_v30 = vld [vmem:[#allocation4 + $0x6b0] sm:$0xff] }
 0x145   :  { %1990 = vmatpush3.msra.mxu1 %v317_v31  ;;  %2248 = vmatprep.subr.mxu0 %v413_v33  ;;  %v918_v31 = vld [vmem:[#allocation4 + $0x8a8] sm:$0xff] }
 0x146   :  { %1991 = vmatprep.subr.mxu1 %v362_v34  ;;  %2249 = vmatpush3.msra.mxu0 %v413_v33  ;;  %v917_v33 = vld [vmem:[#allocation4 + $0x8a0] sm:$0xff]  ;;  %v854_v34 = vld [vmem:[#allocation4 + $0x6a8] sm:$0xff] }
 0x147   :  { %1992 = vmatpush3.msra.mxu1 %v314_v35  ;;  %2250 = vmatprep.subr.mxu0 %v410_v36  ;;  %v915_v35 = vld [vmem:[#allocation4 + $0x890] sm:$0xff] }
 0x148   :  { %693 = vmatmul.mubr.f32.vlgmr.msra.gmra.mxu1 %v306_v38  ;;  %2251 = vmatpush3.msra.mxu0 %v410_v36  ;;  %v822_v38 = vld [vmem:[#allocation4 + $0x5a8] sm:$0xff]  ;;  %v852_v36 = vld [vmem:[#allocation4 + $0x698] sm:$0xff] }
 0x149   :  { %697 = vmatprep.mubr.f32.mxu1 %v310_v51  ;;  %2253 = vmatmul.mubr.f32.vlgmr.msra.gmra.mxu0 %v311_v53  ;;  %v809_v51 = vld [vmem:[#allocation4 + $0x540] sm:$0xff]  ;;  %v806_v53 = vld [vmem:[#allocation4 + $0x528] sm:$0xff] }
 0x14a   :  { %947 = vmatprep.subr.mxu1 %v831_v37  ;;  %1088 = vmatprep.mubr.f32.mxu0 %v2485_v0  ;;  %v914_v37 = vld [vmem:[#allocation4 + $0x888] sm:$0xff] }
 0x14b   :  { %948 = vmatpush1.msra.mxu1 %v830_v39  ;;  %1024 = vmatprep.subr.mxu0 %v927_v17  ;;  %v851_v39 = vld [vmem:[#allocation4 + $0x690] sm:$0xff] }
 0x14c   :  { %698 = vmatmul.mubr.f32.gmra.mxu1 %v309_v54  ;;  %949 = vmatprep.subr.mxu1 %v828_v40  ;;  %v804_v54 = vld [vmem:[#allocation4 + $0x518] sm:$0xff] }
 0x14d   :  { %950 = vmatpush1.msra.mxu1 %v827_v41  ;;  %1025 = vmatpush1.msra.mxu0 %v926_v20  ;;  %v912_v40 = vld [vmem:[#allocation4 + $0x878] sm:$0xff]  ;;  %v849_v41 = vld [vmem:[#allocation4 + $0x680] sm:$0xff] }
 0x14e   :  { %951 = vmatprep.subr.mxu1 %v825_v42  ;;  %1026 = vmatprep.subr.mxu0 %v924_v21  ;;  %v911_v42 = vld [vmem:[#allocation4 + $0x870] sm:$0xff] }
 0x14f   :  { %952 = vmatpush1.msra.mxu1 %v824_v32  ;;  %1027 = vmatpush1.msra.mxu0 %v923_v22  ;;  %v848_v32 = vld [vmem:[#allocation4 + $0x678] sm:$0xff] }
 0x150   :  { %953 = vmatprep.subr.mxu1 %v822_v38  ;;  %1028 = vmatprep.subr.mxu0 %v921_v23  ;;  %v909_v38 = vld [vmem:[#allocation4 + $0x860] sm:$0xff] }
 0x151   :  { %954 = vmatpush1.msra.mxu1 %v821_v43  ;;  %1029 = vmatpush1.msra.mxu0 %v920_v28  ;;  %v846_v43 = vld [vmem:[#allocation4 + $0x668] sm:$0xff] }
 0x152   :  { %955 = vmatprep.subr.mxu1 %v819_v44  ;;  %1030 = vmatprep.subr.mxu0 %v918_v31  ;;  %v908_v44 = vld [vmem:[#allocation4 + $0x858] sm:$0xff]  ;;  %v925_v31 = vld [vmem:[#allocation4 + $0x8e0] sm:$0xff] }
 0x153   :  { %956 = vmatpush1.msra.mxu1 %v818_v45  ;;  %1031 = vmatpush1.msra.mxu0 %v917_v33  ;;  %v845_v45 = vld [vmem:[#allocation4 + $0x660] sm:$0xff] }
 0x154   :  { %957 = vmatprep.subr.mxu1 %v816_v47  ;;  %1032 = vmatprep.subr.mxu0 %v915_v35  ;;  %v906_v47 = vld [vmem:[#allocation4 + $0x848] sm:$0xff] }
 0x155   :  { %958 = vmatpush1.msra.mxu1 %v815_v48  ;;  %1033 = vmatpush1.msra.mxu0 %v914_v37  ;;  %v843_v48 = vld [vmem:[#allocation4 + $0x650] sm:$0xff] }
 0x156   :  { %959 = vmatprep.subr.mxu1 %v813_v49  ;;  %1034 = vmatprep.subr.mxu0 %v912_v40  ;;  %v905_v49 = vld [vmem:[#allocation4 + $0x840] sm:$0xff] }
 0x157   :  { %960 = vmatpush1.msra.mxu1 %v812_v50  ;;  %1035 = vmatpush1.msra.mxu0 %v911_v42  ;;  %v842_v50 = vld [vmem:[#allocation4 + $0x648] sm:$0xff]  ;;  %v916_v42 = vld [vmem:[#allocation4 + $0x898] sm:$0xff] }
 0x158   :  { %961 = vmatprep.subr.mxu1 %v810_v46  ;;  %1036 = vmatprep.subr.mxu0 %v909_v38  ;;  %v903_v46 = vld [vmem:[#allocation4 + $0x830] sm:$0xff]  ;;  %v910_v38 = vld [vmem:[#allocation4 + $0x868] sm:$0xff] }
 0x159   :  { %962 = vmatpush1.msra.mxu1 %v809_v51  ;;  %1037 = vmatpush1.msra.mxu0 %v908_v44  ;;  %v840_v51 = vld [vmem:[#allocation4 + $0x638] sm:$0xff] }
 0x15a   :  { %963 = vmatprep.subr.mxu1 %v807_v52  ;;  %1038 = vmatprep.subr.mxu0 %v906_v47  ;;  %v902_v52 = vld [vmem:[#allocation4 + $0x828] sm:$0xff]  ;;  %v904_v44 = vld [vmem:[#allocation4 + $0x838] sm:$0xff] }
 0x15b   :  { %964 = vmatpush1.msra.mxu1 %v806_v53  ;;  %v839_v53 = vld [vmem:[#allocation4 + $0x630] sm:$0xff]  ;;  %1039 = vmatpush1.msra.mxu0 %v905_v49  ;;  %v898_v47 = vld [vmem:[#allocation4 + $0x808] sm:$0xff]  ;;  %v892_v49 = vld [vmem:[#allocation4 + $0x7d8] sm:$0xff] }
 0x15c   :  { %965 = vmatprep.subr.mxu1 %v804_v54  ;;  %v900_v54 = vld [vmem:[#allocation4 + $0x818] sm:$0xff]  ;;  %1040 = vmatprep.subr.mxu0 %v903_v46  ;;  %v889_v46 = vld [vmem:[#allocation4 + $0x7c0] sm:$0xff] }
 0x15d   :  { %966 = vmatpush1.msra.mxu1 %v803_v55  ;;  %v837_v55 = vld [vmem:[#allocation4 + $0x620] sm:$0xff]  ;;  %1041 = vmatpush1.msra.mxu0 %v902_v52 }
 0x15e   :  { %967 = vmatprep.subr.mxu1 %v801_v56  ;;  %v899_v56 = vld [vmem:[#allocation4 + $0x810] sm:$0xff]  ;;  %1042 = vmatprep.subr.mxu0 %v900_v54  ;;  %v886_v54 = vld [vmem:[#allocation4 + $0x7a8] sm:$0xff] }
 0x15f   :  { %968 = vmatpush1.msra.mxu1 %v800_v57  ;;  %v836_v57 = vld [vmem:[#allocation4 + $0x618] sm:$0xff]  ;;  %1043 = vmatpush1.msra.mxu0 %v899_v56 }
 0x160   :  { %969 = vmatprep.subr.mxu1 %v798_v58  ;;  %v897_v58 = vld [vmem:[#allocation4 + $0x800] sm:$0xff] }
 0x161   :  { %970 = vmatpush1.msra.mxu1 %v797_v59  ;;  %v834_v59 = vld [vmem:[#allocation4 + $0x608] sm:$0xff]  ;;  %1044 = vmatprep.subr.mxu0 %v897_v58 }
 0x162   :  { %971 = vmatprep.subr.mxu1 %v795_v60  ;;  %v896_v60 = vld [vmem:[#allocation4 + $0x7f8] sm:$0xff] }
 0x163   :  { %972 = vmatpush1.msra.mxu1 %v794_v61  ;;  %v833_v61 = vld [vmem:[#allocation4 + $0x600] sm:$0xff]  ;;  %1045 = vmatpush1.msra.mxu0 %v896_v60 }
 0x164   :  { %973 = vmatprep.subr.mxu1 %v792_v62  ;;  %v928_v62 = vld [vmem:[#allocation4 + $0x8f8] sm:$0xff] }
 0x165   :  { %974 = vmatpush1.msra.mxu1 %v791_v63  ;;  %v894_v63 = vld [vmem:[#allocation4 + $0x7e8] sm:$0xff] }
 0x166   :  { %975 = vmatprep.subr.mxu1 %v789_v1  ;;  %1046 = vmatprep.subr.mxu0 %v894_v63  ;;  %v893_v1 = vld [vmem:[#allocation4 + $0x7e0] sm:$0xff] }
 0x167   :  { %976 = vmatpush1.msra.mxu1 %v788_v2  ;;  %1047 = vmatpush1.msra.mxu0 %v893_v1  ;;  %v891_v2 = vld [vmem:[#allocation4 + $0x7d0] sm:$0xff] }
 0x168   :  { %977 = vmatprep.subr.mxu1 %v786_v3  ;;  %1048 = vmatprep.subr.mxu0 %v891_v2  ;;  %v890_v3 = vld [vmem:[#allocation4 + $0x7c8] sm:$0xff]  ;;  %v832_v2 = vld [vmem:[#allocation4 + $0x5f8] sm:$0xff] }
 0x169   :  { %978 = vmatpush1.msra.mxu1 %v785_v4  ;;  %1049 = vmatpush1.msra.mxu0 %v890_v3  ;;  %v888_v4 = vld [vmem:[#allocation4 + $0x7b8] sm:$0xff]  ;;  %v877_v3 = vld [vmem:[#allocation4 + $0x760] sm:$0xff] }
 0x16a   :  { %979 = vmatprep.subr.mxu1 %v879_v5  ;;  %1050 = vmatprep.subr.mxu0 %v888_v4  ;;  %v887_v5 = vld [vmem:[#allocation4 + $0x7b0] sm:$0xff]  ;;  %v829_v4 = vld [vmem:[#allocation4 + $0x5e0] sm:$0xff] }
 0x16b   :  { %980 = vmatpush2.msra.mxu1 %v878_v6  ;;  %1051 = vmatpush1.msra.mxu0 %v887_v5  ;;  %v885_v6 = vld [vmem:[#allocation4 + $0x7a0] sm:$0xff] }
 0x16c   :  { %981 = vmatprep.subr.mxu1 %v876_v7  ;;  %1052 = vmatprep.subr.mxu0 %v885_v6  ;;  %v884_v7 = vld [vmem:[#allocation4 + $0x798] sm:$0xff]  ;;  %v874_v6 = vld [vmem:[#allocation4 + $0x748] sm:$0xff] }
 0x16d   :  { %982 = vmatpush2.msra.mxu1 %v875_v8  ;;  %1053 = vmatpush1.msra.mxu0 %v884_v7  ;;  %v882_v8 = vld [vmem:[#allocation4 + $0x788] sm:$0xff] }
 0x16e   :  { %983 = vmatprep.subr.mxu1 %v873_v9  ;;  %1054 = vmatprep.subr.mxu0 %v882_v8  ;;  %v881_v9 = vld [vmem:[#allocation4 + $0x780] sm:$0xff]  ;;  %v826_v8 = vld [vmem:[#allocation4 + $0x5c8] sm:$0xff] }
 0x16f   :  { %984 = vmatpush2.msra.mxu1 %v872_v10  ;;  %v880_v10 = vld [vmem:[#allocation4 + $0x778] sm:$0xff]  ;;  %1055 = vmatpush1.msra.mxu0 %v881_v9  ;;  %v871_v9 = vld [vmem:[#allocation4 + $0x730] sm:$0xff] }
 0x170   :  { %985 = vmatprep.subr.mxu1 %v870_v11  ;;  %2017 = vmatprep.subr.mxu0 %v880_v10  ;;  %v2584_v11 = vld [vmem:[#allocation7 + $0x1] ss:$8 sm:$0x7] }
 0x171   :  { %986 = vmatpush2.msra.mxu1 %v869_v12  ;;  %v462_v12 = vrot.slane %v2584_v11, %v2545_v25  ;;  %v823_v10 = vld [vmem:[#allocation4 + $0x5b0] sm:$0xff] }
 0x172   :  { %987 = vmatprep.subr.mxu1 %v867_v13  ;;  %v466_v13 = vrot.slane %v2584_v11, %v2547_v26 }
 0x173   :  { %988 = vmatpush2.msra.mxu1 %v866_v14 }
 0x174   :  { %989 = vmatprep.subr.mxu1 %v864_v15 }
 0x175   :  { %990 = vmatpush2.msra.mxu1 %v863_v16 }
 0x176   :  { %991 = vmatprep.subr.mxu1 %v861_v18 }
 0x177   :  { %992 = vmatpush2.msra.mxu1 %v860_v19 }
 0x178   :  { %993 = vmatprep.subr.mxu1 %v858_v24 }
 0x179   :  { %994 = vmatpush2.msra.mxu1 %v857_v27 }
 0x17a   :  { %995 = vmatprep.subr.mxu1 %v855_v30 }
 0x17b   :  { %996 = vmatpush2.msra.mxu1 %v854_v34 }
 0x17c   :  { %997 = vmatprep.subr.mxu1 %v852_v36  ;;  %v922_v36 = vld [vmem:[#allocation4 + $0x8c8] sm:$0xff] }
 0x17d   :  { %998 = vmatpush2.msra.mxu1 %v851_v39  ;;  %v919_v39 = vld [vmem:[#allocation4 + $0x8b0] sm:$0xff] }
 0x17e   :  { %999 = vmatprep.subr.mxu1 %v849_v41 }
 0x17f   :  { %1000 = vmatpush2.msra.mxu1 %v848_v32  ;;  %v913_v32 = vld [vmem:[#allocation4 + $0x880] sm:$0xff] }
 0x180   :  { %1001 = vmatprep.subr.mxu1 %v846_v43  ;;  %v907_v43 = vld [vmem:[#allocation4 + $0x850] sm:$0xff] }
 0x181   :  { %1002 = vmatpush2.msra.mxu1 %v845_v45  ;;  %v901_v45 = vld [vmem:[#allocation4 + $0x820] sm:$0xff] }
 0x182   :  { %1003 = vmatprep.subr.mxu1 %v843_v48  ;;  %v895_v48 = vld [vmem:[#allocation4 + $0x7f0] sm:$0xff] }
 0x183   :  { %1004 = vmatpush2.msra.mxu1 %v842_v50 }
 0x184   :  { %1005 = vmatprep.subr.mxu1 %v840_v51  ;;  %v470_v51 = vrot.slane %v2584_v11, %v2550_v29  ;;  %v868_v11 = vld [vmem:[#allocation4 + $0x718] sm:$0xff] }
 0x185   :  { %1006 = vmatpush2.msra.mxu1 %v839_v53 }
 0x186   :  { %1007 = vmatprep.subr.mxu1 %v837_v55 }
 0x187   :  { %1008 = vmatpush2.msra.mxu1 %v836_v57  ;;  %v883_v57 = vld [vmem:[#allocation4 + $0x790] sm:$0xff] }
 0x188   :  { %1009 = vmatprep.subr.mxu1 %v834_v59 }
 0x189   :  { %1010 = vmatpush2.msra.mxu1 %v833_v61 }
 0x18a   :  { %2255 = vmatprep.subr.mxu1 %v928_v62 }
 0x1e5   :  { %v617_v14 = vpop.f32.mrf.mxu1 }
 0x1e6   :  { %v540_v15 = vpop.f32.mrf.mxu0 }
 0x1e7   :  { %v541_v16 = vadd.f32 %v540_v15, %v462_v12  ;;  %v619_v18 = vpop.f32.mrf.mxu1  ;;  %v862_v15 = vld [vmem:[#allocation4 + $0x6e8] sm:$0xff] }
 0x1e8   :  { %v542_v17 = vpop.f32.mrf.mxu0 }
 0x1e9   :  { %v543_v19 = vadd.f32 %v542_v17, %v466_v13  ;;  %v2590_v20 = vadd.f32 %v617_v14, %v541_v16  ;;  %v817_v14 = vld [vmem:[#allocation4 + $0x580] sm:$0xff]  ;;  %v814_v16 = vld [vmem:[#allocation4 + $0x568] sm:$0xff]  ;;  %v859_v17 = vld [vmem:[#allocation4 + $0x6d0] sm:$0xff] }
 0x1eb   :  { %v2592_v21 = vadd.f32 %v619_v18, %v543_v19  ;;  %v623_v23 = vpop.f32.mrf.mxu1  ;;  %v778_v27 = vmax.f32 %v2590_v20, 0.0  ;;  %v811_v18 = vld [vmem:[#allocation4 + $0x550] sm:$0xff]  ;;  %v856_v19 = vld [vmem:[#allocation4 + $0x6b8] sm:$0xff]  ;;  %v1291_v20 = vld [vmem:[#allocation4 + $0xa08] sm:$0xff] }
 0x1ec   :  { %v546_v24 = vpop.f32.mrf.mxu0 }
 0x1ed   :  { %v779_v22 = vmax.f32 %v2592_v21, 0.0  ;;  %v547_v28 = vadd.f32 %v546_v24, %v462_v12  ;;  %v625_v35 = vpop.f32.mrf.mxu1  ;;  %v820_v12 = vld [vmem:[#allocation4 + $0x598] sm:$0xff]  ;;  %v850_v24 = vld [vmem:[#allocation4 + $0x688] sm:$0xff] }
 0x1ee   :  { %v548_v30 = vpop.f32.mrf.mxu0  ;;  %v808_v21 = vld [vmem:[#allocation4 + $0x538] sm:$0xff] }
 0x1ef   :  { %1011 = vmatprep.mubr.f32.mxu1 %v779_v22  ;;  %v549_v33 = vadd.f32 %v548_v30, %v466_v13  ;;  %v2600_v34 = vadd.f32 %v623_v23, %v547_v28  ;;  %v865_v13 = vld [vmem:[#allocation4 + $0x700] sm:$0xff]  ;;  %v802_v28 = vld [vmem:[#allocation4 + $0x508] sm:$0xff]  ;;  %v847_v30 = vld [vmem:[#allocation4 + $0x670] sm:$0xff] }
 0x1f0   :  { %1012 = vmatmul.mubr.f32.vlgmr.msra.gmra.mxu1 %v778_v27  ;;  %v805_v23 = vld [vmem:[#allocation4 + $0x520] sm:$0xff] }
 0x1f1   :  { %2256 = vmatpush3.msra.mxu1 %v928_v62  ;;  %v2602_v37 = vadd.f32 %v625_v35, %v549_v33  ;;  %v781_v41 = vmax.f32 %v2600_v34, 0.0  ;;  %v844_v33 = vld [vmem:[#allocation4 + $0x658] sm:$0xff]  ;;  %v1280_v34 = vld [vmem:[#allocation4 + $0x9b0] sm:$0xff] }
 0x1f2   :  { %2257 = vmatprep.subr.mxu1 %v925_v31  ;;  %v796_v35 = vld [vmem:[#allocation4 + $0x4d8] sm:$0xff] }
 0x1f3   :  { %2258 = vmatpush3.msra.mxu1 %v925_v31  ;;  %v782_v40 = vmax.f32 %v2602_v37, 0.0  ;;  %v799_v31 = vld [vmem:[#allocation4 + $0x4f0] sm:$0xff] }
 0x1f4   :  { %2259 = vmatprep.subr.mxu1 %v922_v36  ;;  %v1288_v37 = vld [vmem:[#allocation4 + $0x9f0] sm:$0xff] }
 0x1f5   :  { %2260 = vmatpush3.msra.mxu1 %v922_v36  ;;  %1017 = vmatprep.mubr.f32.mxu1 %v782_v40  ;;  %v841_v36 = vld [vmem:[#allocation4 + $0x640] sm:$0xff] }
 0x1f6   :  { %2261 = vmatprep.subr.mxu1 %v919_v39  ;;  %1018 = vmatmul.mubr.f32.gmra.mxu1 %v781_v41 }
 0x1f7   :  { %2262 = vmatpush3.msra.mxu1 %v919_v39  ;;  %v793_v39 = vld [vmem:[#allocation4 + $0x4c0] sm:$0xff] }
 0x1f8   :  { %2263 = vmatprep.subr.mxu1 %v916_v42 }
 0x1f9   :  { %2264 = vmatpush3.msra.mxu1 %v916_v42  ;;  %v838_v42 = vld [vmem:[#allocation4 + $0x628] sm:$0xff] }
 0x1fa   :  { %2265 = vmatprep.subr.mxu1 %v913_v32 }
 0x1fb   :  { %2266 = vmatpush3.msra.mxu1 %v913_v32  ;;  %v790_v32 = vld [vmem:[#allocation4 + $0x4a8] sm:$0xff] }
 0x1fc   :  { %2267 = vmatprep.subr.mxu1 %v910_v38 }
 0x1fd   :  { %2268 = vmatpush3.msra.mxu1 %v910_v38  ;;  %v835_v38 = vld [vmem:[#allocation4 + $0x610] sm:$0xff] }
 0x1fe   :  { %2269 = vmatprep.subr.mxu1 %v907_v43 }
 0x1ff   :  { %2270 = vmatpush3.msra.mxu1 %v907_v43  ;;  %v787_v43 = vld [vmem:[#allocation4 + $0x490] sm:$0xff] }
 0x200   :  { %2271 = vmatprep.subr.mxu1 %v904_v44 }
 0x201   :  { %2272 = vmatpush3.msra.mxu1 %v904_v44  ;;  %v1304_v44 = vld [vmem:[#allocation4 + $0xa70] sm:$0xff] }
 0x202   :  { %2273 = vmatprep.subr.mxu1 %v901_v45 }
 0x203   :  { %2274 = vmatpush3.msra.mxu1 %v901_v45  ;;  %v1303_v45 = vld [vmem:[#allocation4 + $0xa68] sm:$0xff] }
 0x204   :  { %2275 = vmatprep.subr.mxu1 %v898_v47 }
 0x205   :  { %2276 = vmatpush3.msra.mxu1 %v898_v47  ;;  %v1301_v47 = vld [vmem:[#allocation4 + $0xa58] sm:$0xff] }
 0x206   :  { %2277 = vmatprep.subr.mxu1 %v895_v48 }
 0x207   :  { %2278 = vmatpush3.msra.mxu1 %v895_v48  ;;  %v1300_v48 = vld [vmem:[#allocation4 + $0xa50] sm:$0xff] }
 0x208   :  { %v1993_v50 = vpop.f32.mrf.mxu1  ;;  %2279 = vmatprep.subr.mxu1 %v892_v49 }
 0x209   :  { %v2254_v52 = vpop.f32.mrf.mxu0  ;;  %2280 = vmatpush3.msra.mxu1 %v892_v49  ;;  %v1298_v49 = vld [vmem:[#allocation4 + $0xa40] sm:$0xff] }
 0x20a   :  { %v1994_v53 = vpop.f32.mrf.mxu1  ;;  %2281 = vmatprep.subr.mxu1 %v889_v46 }
 0x20b   :  { %v1995_v55 = vadd.f32 %v1994_v53, %v1993_v50  ;;  %2282 = vmatpush3.msra.mxu1 %v889_v46  ;;  %v769_v59 = vpop.f32.mrf.mxu0  ;;  %v1297_v50 = vld [vmem:[#allocation4 + $0xa38] sm:$0xff]  ;;  %v1295_v46 = vld [vmem:[#allocation4 + $0xa28] sm:$0xff] }
 0x20c   :  { %v1996_v56 = vpop.f32.mrf.mxu1  ;;  %2283 = vmatprep.subr.mxu1 %v886_v54  ;;  %v1285_v53 = vld [vmem:[#allocation4 + $0x9d8] sm:$0xff] }
 0x20d   :  { %v695_v58 = vadd.f32 %v1995_v55, %v470_v51  ;;  %2284 = vmatpush3.msra.mxu1 %v886_v54  ;;  %v1283_v54 = vld [vmem:[#allocation4 + $0x9c8] sm:$0xff]  ;;  %v1282_v55 = vld [vmem:[#allocation4 + $0x9c0] sm:$0xff] }
 0x20e   :  { %v1997_v60 = vpop.f32.mrf.mxu1  ;;  %2285 = vmatprep.subr.mxu1 %v883_v57 }
 0x20f   :  { %v770_v61 = vadd.f32 %v769_v59, %v695_v58  ;;  %v1998_v62 = vadd.f32 %v1997_v60, %v1996_v56  ;;  %2286 = vmatpush3.msra.mxu1 %v883_v57  ;;  %v1277_v56 = vld [vmem:[#allocation4 + $0x998] sm:$0xff]  ;;  %v1276_v57 = vld [vmem:[#allocation4 + $0x990] sm:$0xff]  ;;  %v1274_v58 = vld [vmem:[#allocation4 + $0x980] sm:$0xff] }
 0x210   :  { %v1273_v59 = vld [vmem:[#allocation4 + $0x978] sm:$0xff]  ;;  %v1271_v60 = vld [vmem:[#allocation4 + $0x968] sm:$0xff] }
 0x211   :  { %v780_v63 = vmax.f32 %v770_v61, 0.0  ;;  %v700_v1 = vadd.f32 %v1998_v62, %v470_v51  ;;  %v1294_v51 = vld [vmem:[#allocation4 + $0xa20] sm:$0xff]  ;;  %v1268_v62 = vld [vmem:[#allocation4 + $0x950] sm:$0xff] }
 0x212   :  { %v1270_v61 = vld [vmem:[#allocation4 + $0x960] sm:$0xff] }
 0x213   :  { %1089 = vmatmul.mubr.f32.vlgmr.msra.gmra.mxu0 %v780_v63  ;;  %2287 = vmatprep.mubr.f32.mxu1 %v780_v63  ;;  %v775_v5 = vadd.f32 %v2254_v52, %v700_v1  ;;  %v1292_v52 = vld [vmem:[#allocation4 + $0xa10] sm:$0xff]  ;;  %v1267_v63 = vld [vmem:[#allocation4 + $0x948] sm:$0xff]  ;;  %v1265_v1 = vld [vmem:[#allocation4 + $0x938] sm:$0xff] }
 0x214   :  { %2018 = vmatpush3.msra.mxu0 %v832_v2  ;;  %1094 = vmatprep.mubr.f32.mxu0 %v2485_v0  ;;  %v1264_v2 = vld [vmem:[#allocation4 + $0x930] sm:$0xff] }
 0x215   :  { %2019 = vmatprep.subr.mxu0 %v877_v3  ;;  %v783_v7 = vmax.f32 %v775_v5, 0.0  ;;  %v1262_v3 = vld [vmem:[#allocation4 + $0x920] sm:$0xff]  ;;  %v1259_v5 = vld [vmem:[#allocation4 + $0x908] sm:$0xff] }
 0x216   :  { %2020 = vmatpush3.msra.mxu0 %v829_v4  ;;  %v1261_v4 = vld [vmem:[#allocation4 + $0x918] sm:$0xff] }
 0x217   :  { %2021 = vmatprep.subr.mxu0 %v874_v6  ;;  %1095 = vmatmul.mubr.f32.gmra.mxu0 %v783_v7  ;;  %v1258_v6 = vld [vmem:[#allocation4 + $0x900] sm:$0xff] }
 0x218   :  { %2022 = vmatpush3.msra.mxu0 %v826_v8  ;;  %2288 = vmatmul.mubr.f32.vlgmr.msra.gmra.mxu1 %v783_v7  ;;  %v1352_v7 = vld [vmem:[#allocation4 + $0xbf0] sm:$0xff]  ;;  %v1351_v8 = vld [vmem:[#allocation4 + $0xbe8] sm:$0xff] }
 0x219   :  { %2023 = vmatprep.subr.mxu0 %v871_v9  ;;  %1165 = vmatprep.mubr.f32.mxu0 %v779_v22  ;;  %v853_v22 = vld [vmem:[#allocation4 + $0x6a0] sm:$0xff]  ;;  %v1349_v9 = vld [vmem:[#allocation4 + $0xbd8] sm:$0xff] }
 0x21a   :  { %2024 = vmatpush3.msra.mxu0 %v823_v10  ;;  %1561 = vmatprep.mubr.f32.mxu1 %v2485_v0  ;;  %v1348_v10 = vld [vmem:[#allocation4 + $0xbd0] sm:$0xff] }
 0x21b   :  { %2025 = vmatprep.subr.mxu0 %v868_v11  ;;  %v1346_v11 = vld [vmem:[#allocation4 + $0xbc0] sm:$0xff] }
 0x21c   :  { %2026 = vmatpush3.msra.mxu0 %v820_v12  ;;  %v1345_v12 = vld [vmem:[#allocation4 + $0xbb8] sm:$0xff] }
 0x21d   :  { %2027 = vmatprep.subr.mxu0 %v865_v13  ;;  %v1343_v13 = vld [vmem:[#allocation4 + $0xba8] sm:$0xff] }
 0x21e   :  { %2028 = vmatpush3.msra.mxu0 %v817_v14  ;;  %v1342_v14 = vld [vmem:[#allocation4 + $0xba0] sm:$0xff] }
 0x21f   :  { %2029 = vmatprep.subr.mxu0 %v862_v15  ;;  %v1340_v15 = vld [vmem:[#allocation4 + $0xb90] sm:$0xff] }
 0x220   :  { %2030 = vmatpush3.msra.mxu0 %v814_v16  ;;  %v1339_v16 = vld [vmem:[#allocation4 + $0xb88] sm:$0xff] }
 0x221   :  { %2031 = vmatprep.subr.mxu0 %v859_v17  ;;  %v1337_v17 = vld [vmem:[#allocation4 + $0xb78] sm:$0xff] }
 0x222   :  { %2032 = vmatpush3.msra.mxu0 %v811_v18  ;;  %v1336_v18 = vld [vmem:[#allocation4 + $0xb70] sm:$0xff] }
 0x223   :  { %2033 = vmatprep.subr.mxu0 %v856_v19  ;;  %v1334_v19 = vld [vmem:[#allocation4 + $0xb60] sm:$0xff] }
 0x224   :  { %2034 = vmatpush3.msra.mxu0 %v808_v21  ;;  %v1400_v21 = vld [vmem:[#allocation4 + $0xd70] sm:$0xff] }
 0x225   :  { %2035 = vmatprep.subr.mxu0 %v853_v22  ;;  %v1399_v22 = vld [vmem:[#allocation4 + $0xd68] sm:$0xff]  ;;  %1497 = vmatprep.subr.mxu1 %v1400_v21 }
 0x226   :  { %2036 = vmatpush3.msra.mxu0 %v805_v23  ;;  %v1333_v23 = vld [vmem:[#allocation4 + $0xb58] sm:$0xff]  ;;  %1498 = vmatpush1.msra.mxu1 %v1399_v22 }
 0x227   :  { %2037 = vmatprep.subr.mxu0 %v850_v24  ;;  %v1331_v24 = vld [vmem:[#allocation4 + $0xb48] sm:$0xff] }
 0x228   :  { %2038 = vmatpush3.msra.mxu0 %v802_v28  ;;  %v1330_v28 = vld [vmem:[#allocation4 + $0xb40] sm:$0xff] }
 0x229   :  { %2039 = vmatprep.subr.mxu0 %v847_v30  ;;  %v1397_v30 = vld [vmem:[#allocation4 + $0xd58] sm:$0xff] }
 0x22a   :  { %2040 = vmatpush3.msra.mxu0 %v799_v31  ;;  %1499 = vmatprep.subr.mxu1 %v1397_v30  ;;  %v1396_v31 = vld [vmem:[#allocation4 + $0xd50] sm:$0xff] }
 0x22b   :  { %2041 = vmatprep.subr.mxu0 %v844_v33  ;;  %v1394_v33 = vld [vmem:[#allocation4 + $0xd40] sm:$0xff]  ;;  %1500 = vmatpush1.msra.mxu1 %v1396_v31 }
 0x22c   :  { %2042 = vmatpush3.msra.mxu0 %v796_v35  ;;  %v1393_v35 = vld [vmem:[#allocation4 + $0xd38] sm:$0xff]  ;;  %1501 = vmatprep.subr.mxu1 %v1394_v33 }
 0x22d   :  { %2043 = vmatprep.subr.mxu0 %v841_v36  ;;  %v1328_v36 = vld [vmem:[#allocation4 + $0xb30] sm:$0xff]  ;;  %1502 = vmatpush1.msra.mxu1 %v1393_v35 }
 0x22e   :  { %2044 = vmatpush3.msra.mxu0 %v793_v39  ;;  %v1391_v39 = vld [vmem:[#allocation4 + $0xd28] sm:$0xff] }
 0x22f   :  { %2045 = vmatprep.subr.mxu0 %v838_v42  ;;  %v1327_v42 = vld [vmem:[#allocation4 + $0xb28] sm:$0xff]  ;;  %1503 = vmatprep.subr.mxu1 %v1391_v39 }
 0x230   :  { %2046 = vmatpush3.msra.mxu0 %v790_v32  ;;  %v1390_v32 = vld [vmem:[#allocation4 + $0xd20] sm:$0xff] }
 0x231   :  { %2047 = vmatprep.subr.mxu0 %v835_v38  ;;  %v1325_v38 = vld [vmem:[#allocation4 + $0xb18] sm:$0xff]  ;;  %1504 = vmatpush1.msra.mxu1 %v1390_v32 }
 0x232   :  { %2048 = vmatpush3.msra.mxu0 %v787_v43  ;;  %v1388_v43 = vld [vmem:[#allocation4 + $0xd10] sm:$0xff] }
 0x233   :  { %1166 = vmatmul.mubr.f32.vlgmr.msra.gmra.mxu0 %v778_v27  ;;  %1420 = vmatprep.subr.mxu0 %v1304_v44  ;;  %v1289_v27 = vld [vmem:[#allocation4 + $0x9f8] sm:$0xff]  ;;  %v1324_v44 = vld [vmem:[#allocation4 + $0xb10] sm:$0xff] }
 0x234   :  { %1170 = vmatprep.mubr.f32.mxu0 %v782_v40  ;;  %1421 = vmatpush1.msra.mxu0 %v1303_v45  ;;  %v1286_v40 = vld [vmem:[#allocation4 + $0x9e0] sm:$0xff]  ;;  %v1387_v45 = vld [vmem:[#allocation4 + $0xd08] sm:$0xff] }
 0x235   :  { %1422 = vmatprep.subr.mxu0 %v1301_v47  ;;  %v1322_v47 = vld [vmem:[#allocation4 + $0xb00] sm:$0xff]  ;;  %1505 = vmatprep.subr.mxu1 %v1388_v43 }
 0x236   :  { %1423 = vmatpush1.msra.mxu0 %v1300_v48  ;;  %v1385_v48 = vld [vmem:[#allocation4 + $0xcf8] sm:$0xff]  ;;  %1506 = vmatpush1.msra.mxu1 %v1387_v45  ;;  %v1398_v43 = vld [vmem:[#allocation4 + $0xd60] sm:$0xff]  ;;  %v1395_v45 = vld [vmem:[#allocation4 + $0xd48] sm:$0xff] }
 0x237   :  { %1171 = vmatmul.mubr.f32.gmra.mxu0 %v781_v41  ;;  %1424 = vmatprep.subr.mxu0 %v1298_v49  ;;  %v1279_v41 = vld [vmem:[#allocation4 + $0x9a8] sm:$0xff]  ;;  %v1321_v49 = vld [vmem:[#allocation4 + $0xaf8] sm:$0xff] }
 0x238   :  { %1425 = vmatpush1.msra.mxu0 %v1297_v50  ;;  %v1384_v50 = vld [vmem:[#allocation4 + $0xcf0] sm:$0xff]  ;;  %1507 = vmatprep.subr.mxu1 %v1385_v48 }
 0x239   :  { %1426 = vmatprep.subr.mxu0 %v1295_v46  ;;  %v1319_v46 = vld [vmem:[#allocation4 + $0xae8] sm:$0xff]  ;;  %1508 = vmatpush1.msra.mxu1 %v1384_v50  ;;  %v1392_v48 = vld [vmem:[#allocation4 + $0xd30] sm:$0xff]  ;;  %v1386_v50 = vld [vmem:[#allocation4 + $0xd00] sm:$0xff] }
 0x23a   :  { %1427 = vmatpush1.msra.mxu0 %v1294_v51  ;;  %v1382_v51 = vld [vmem:[#allocation4 + $0xce0] sm:$0xff] }
 0x23b   :  { %1428 = vmatprep.subr.mxu0 %v1292_v52  ;;  %v1318_v52 = vld [vmem:[#allocation4 + $0xae0] sm:$0xff]  ;;  %1509 = vmatprep.subr.mxu1 %v1382_v51  ;;  %v1380_v51 = vld [vmem:[#allocation4 + $0xcd0] sm:$0xff] }
 0x23c   :  { %1429 = vmatpush1.msra.mxu0 %v1291_v20  ;;  %v1381_v20 = vld [vmem:[#allocation4 + $0xcd8] sm:$0xff] }
 0x23d   :  { %1430 = vmatprep.subr.mxu0 %v1289_v27  ;;  %v1316_v27 = vld [vmem:[#allocation4 + $0xad0] sm:$0xff]  ;;  %1510 = vmatpush1.msra.mxu1 %v1381_v20  ;;  %v1374_v20 = vld [vmem:[#allocation4 + $0xca0] sm:$0xff] }
 0x23e   :  { %1431 = vmatpush1.msra.mxu0 %v1288_v37  ;;  %v1379_v37 = vld [vmem:[#allocation4 + $0xcc8] sm:$0xff] }
 0x23f   :  { %1432 = vmatprep.subr.mxu0 %v1286_v40  ;;  %v1315_v40 = vld [vmem:[#allocation4 + $0xac8] sm:$0xff]  ;;  %1511 = vmatprep.subr.mxu1 %v1379_v37  ;;  %v1368_v37 = vld [vmem:[#allocation4 + $0xc70] sm:$0xff] }
 0x240   :  { %1433 = vmatpush1.msra.mxu0 %v1285_v53  ;;  %v1378_v53 = vld [vmem:[#allocation4 + $0xcc0] sm:$0xff] }
 0x241   :  { %1434 = vmatprep.subr.mxu0 %v1283_v54  ;;  %v1313_v54 = vld [vmem:[#allocation4 + $0xab8] sm:$0xff]  ;;  %1512 = vmatpush1.msra.mxu1 %v1378_v53  ;;  %v1362_v53 = vld [vmem:[#allocation4 + $0xc40] sm:$0xff] }
 0x242   :  { %1435 = vmatpush1.msra.mxu0 %v1282_v55  ;;  %v1376_v55 = vld [vmem:[#allocation4 + $0xcb0] sm:$0xff] }
 0x243   :  { %1436 = vmatprep.subr.mxu0 %v1280_v34  ;;  %v1312_v34 = vld [vmem:[#allocation4 + $0xab0] sm:$0xff]  ;;  %1513 = vmatprep.subr.mxu1 %v1376_v55 }
 0x244   :  { %1437 = vmatpush1.msra.mxu0 %v1279_v41  ;;  %v1375_v41 = vld [vmem:[#allocation4 + $0xca8] sm:$0xff] }
 0x245   :  { %1438 = vmatprep.subr.mxu0 %v1277_v56  ;;  %v1310_v56 = vld [vmem:[#allocation4 + $0xaa0] sm:$0xff]  ;;  %1514 = vmatpush1.msra.mxu1 %v1375_v41 }
 0x246   :  { %1439 = vmatpush1.msra.mxu0 %v1276_v57  ;;  %v1373_v57 = vld [vmem:[#allocation4 + $0xc98] sm:$0xff] }
 0x247   :  { %1440 = vmatprep.subr.mxu0 %v1274_v58  ;;  %v1309_v58 = vld [vmem:[#allocation4 + $0xa98] sm:$0xff]  ;;  %1515 = vmatprep.subr.mxu1 %v1373_v57 }
 0x248   :  { %1441 = vmatpush1.msra.mxu0 %v1273_v59  ;;  %v1372_v59 = vld [vmem:[#allocation4 + $0xc90] sm:$0xff] }
 0x249   :  { %1442 = vmatprep.subr.mxu0 %v1271_v60  ;;  %v1307_v60 = vld [vmem:[#allocation4 + $0xa88] sm:$0xff]  ;;  %1516 = vmatpush1.msra.mxu1 %v1372_v59 }
 0x24a   :  { %1443 = vmatpush1.msra.mxu0 %v1270_v61  ;;  %v1370_v61 = vld [vmem:[#allocation4 + $0xc80] sm:$0xff] }
 0x24b   :  { %1444 = vmatprep.subr.mxu0 %v1268_v62  ;;  %v1306_v62 = vld [vmem:[#allocation4 + $0xa80] sm:$0xff]  ;;  %1517 = vmatprep.subr.mxu1 %v1370_v61 }
 0x24c   :  { %1445 = vmatpush1.msra.mxu0 %v1267_v63  ;;  %v1369_v63 = vld [vmem:[#allocation4 + $0xc78] sm:$0xff] }
 0x24d   :  { %1446 = vmatprep.subr.mxu0 %v1265_v1  ;;  %v1401_v1 = vld [vmem:[#allocation4 + $0xd78] sm:$0xff]  ;;  %1518 = vmatpush1.msra.mxu1 %v1369_v63 }
 0x24e   :  { %1447 = vmatpush1.msra.mxu0 %v1264_v2  ;;  %v1367_v2 = vld [vmem:[#allocation4 + $0xc68] sm:$0xff] }
 0x24f   :  { %1448 = vmatprep.subr.mxu0 %v1262_v3  ;;  %1519 = vmatprep.subr.mxu1 %v1367_v2  ;;  %v1366_v3 = vld [vmem:[#allocation4 + $0xc60] sm:$0xff] }
 0x250   :  { %1449 = vmatpush1.msra.mxu0 %v1261_v4  ;;  %1520 = vmatpush1.msra.mxu1 %v1366_v3  ;;  %v1364_v4 = vld [vmem:[#allocation4 + $0xc50] sm:$0xff] }
 0x251   :  { %1450 = vmatprep.subr.mxu0 %v1259_v5  ;;  %1521 = vmatprep.subr.mxu1 %v1364_v4  ;;  %v1363_v5 = vld [vmem:[#allocation4 + $0xc48] sm:$0xff]  ;;  %v1305_v4 = vld [vmem:[#allocation4 + $0xa78] sm:$0xff] }
 0x252   :  { %1451 = vmatpush1.msra.mxu0 %v1258_v6  ;;  %1522 = vmatpush1.msra.mxu1 %v1363_v5  ;;  %v1361_v6 = vld [vmem:[#allocation4 + $0xc38] sm:$0xff]  ;;  %v1350_v5 = vld [vmem:[#allocation4 + $0xbe0] sm:$0xff] }
 0x253   :  { %1452 = vmatprep.subr.mxu0 %v1352_v7  ;;  %1523 = vmatprep.subr.mxu1 %v1361_v6  ;;  %v1360_v7 = vld [vmem:[#allocation4 + $0xc30] sm:$0xff]  ;;  %v1302_v6 = vld [vmem:[#allocation4 + $0xa60] sm:$0xff] }
 0x254   :  { %1453 = vmatpush2.msra.mxu0 %v1351_v8  ;;  %1524 = vmatpush1.msra.mxu1 %v1360_v7  ;;  %v1358_v8 = vld [vmem:[#allocation4 + $0xc20] sm:$0xff] }
 0x255   :  { %1454 = vmatprep.subr.mxu0 %v1349_v9  ;;  %1525 = vmatprep.subr.mxu1 %v1358_v8  ;;  %v1357_v9 = vld [vmem:[#allocation4 + $0xc18] sm:$0xff]  ;;  %v1347_v8 = vld [vmem:[#allocation4 + $0xbc8] sm:$0xff] }
 0x256   :  { %1455 = vmatpush2.msra.mxu0 %v1348_v10  ;;  %1526 = vmatpush1.msra.mxu1 %v1357_v9  ;;  %v1355_v10 = vld [vmem:[#allocation4 + $0xc08] sm:$0xff] }
 0x257   :  { %1456 = vmatprep.subr.mxu0 %v1346_v11  ;;  %1527 = vmatprep.subr.mxu1 %v1355_v10  ;;  %v1354_v11 = vld [vmem:[#allocation4 + $0xc00] sm:$0xff]  ;;  %v1299_v10 = vld [vmem:[#allocation4 + $0xa48] sm:$0xff] }
 0x258   :  { %1457 = vmatpush2.msra.mxu0 %v1345_v12  ;;  %1528 = vmatpush1.msra.mxu1 %v1354_v11  ;;  %v1353_v12 = vld [vmem:[#allocation4 + $0xbf8] sm:$0xff]  ;;  %v1344_v11 = vld [vmem:[#allocation4 + $0xbb0] sm:$0xff] }
 0x259   :  { %1458 = vmatprep.subr.mxu0 %v1343_v13  ;;  %2073 = vmatprep.subr.mxu1 %v1353_v12  ;;  %v1296_v12 = vld [vmem:[#allocation4 + $0xa30] sm:$0xff] }
 0x25a   :  { %1459 = vmatpush2.msra.mxu0 %v1342_v14  ;;  %v2622_v14 = vld [vmem:[#allocation7 + $0x2] ss:$8 sm:$0x7] }
 0x25b   :  { %1460 = vmatprep.subr.mxu0 %v1340_v15  ;;  %v943_v55 = vrot.slane %v2622_v14, %v2550_v29 }
 0x25c   :  { %1461 = vmatpush2.msra.mxu0 %v1339_v16  ;;  %v935_v16 = vrot.slane %v2622_v14, %v2545_v25 }
 0x25d   :  { %1462 = vmatprep.subr.mxu0 %v1337_v17  ;;  %v939_v17 = vrot.slane %v2622_v14, %v2547_v26  ;;  %v1293_v14 = vld [vmem:[#allocation4 + $0xa18] sm:$0xff] }
 0x25e   :  { %1463 = vmatpush2.msra.mxu0 %v1336_v18 }
 0x25f   :  { %1464 = vmatprep.subr.mxu0 %v1334_v19 }
 0x260   :  { %1465 = vmatpush2.msra.mxu0 %v1333_v23 }
 0x261   :  { %1466 = vmatprep.subr.mxu0 %v1331_v24 }
 0x262   :  { %1467 = vmatpush2.msra.mxu0 %v1330_v28 }
 0x263   :  { %1468 = vmatprep.subr.mxu0 %v1328_v36 }
 0x264   :  { %1469 = vmatpush2.msra.mxu0 %v1327_v42 }
 0x265   :  { %1470 = vmatprep.subr.mxu0 %v1325_v38 }
 0x266   :  { %1471 = vmatpush2.msra.mxu0 %v1324_v44 }
 0x267   :  { %1472 = vmatprep.subr.mxu0 %v1322_v47 }
 0x268   :  { %1473 = vmatpush2.msra.mxu0 %v1321_v49  ;;  %v1389_v49 = vld [vmem:[#allocation4 + $0xd18] sm:$0xff] }
 0x269   :  { %1474 = vmatprep.subr.mxu0 %v1319_v46  ;;  %v1383_v46 = vld [vmem:[#allocation4 + $0xce8] sm:$0xff] }
 0x26a   :  { %1475 = vmatpush2.msra.mxu0 %v1318_v52  ;;  %v1377_v52 = vld [vmem:[#allocation4 + $0xcb8] sm:$0xff] }
 0x26b   :  { %1476 = vmatprep.subr.mxu0 %v1316_v27  ;;  %v1371_v27 = vld [vmem:[#allocation4 + $0xc88] sm:$0xff] }
 0x26c   :  { %1477 = vmatpush2.msra.mxu0 %v1315_v40  ;;  %v1365_v40 = vld [vmem:[#allocation4 + $0xc58] sm:$0xff] }
 0x26d   :  { %1478 = vmatprep.subr.mxu0 %v1313_v54 }
 0x26e   :  { %1479 = vmatpush2.msra.mxu0 %v1312_v34  ;;  %v1359_v34 = vld [vmem:[#allocation4 + $0xc28] sm:$0xff] }
 0x26f   :  { %1480 = vmatprep.subr.mxu0 %v1310_v56 }
 0x270   :  { %1481 = vmatpush2.msra.mxu0 %v1309_v58  ;;  %v1356_v58 = vld [vmem:[#allocation4 + $0xc10] sm:$0xff] }
 0x271   :  { %1482 = vmatprep.subr.mxu0 %v1307_v60 }
 0x272   :  { %1483 = vmatpush2.msra.mxu0 %v1306_v62 }
 0x273   :  { %2290 = vmatprep.subr.mxu0 %v1401_v1 }
 0x2b0   :  { %v1013_v13 = vpop.f32.mrf.mxu1 }
 0x2b1   :  { %v1014_v19 = vadd.f32 %v1013_v13, %v935_v16  ;;  %v1341_v13 = vld [vmem:[#allocation4 + $0xb98] sm:$0xff] }
 0x2b2   :  { %v1015_v15 = vpop.f32.mrf.mxu1 }
 0x2b3   :  { %v1016_v22 = vadd.f32 %v1015_v15, %v939_v17  ;;  %v1338_v15 = vld [vmem:[#allocation4 + $0xb80] sm:$0xff] }
 0x2b6   :  { %v1019_v18 = vpop.f32.mrf.mxu1 }
 0x2b7   :  { %v1020_v31 = vadd.f32 %v1019_v18, %v935_v16  ;;  %v1335_v16 = vld [vmem:[#allocation4 + $0xb68] sm:$0xff]  ;;  %v1332_v18 = vld [vmem:[#allocation4 + $0xb50] sm:$0xff] }
 0x2b8   :  { %v1021_v23 = vpop.f32.mrf.mxu1 }
 0x2b9   :  { %v1022_v35 = vadd.f32 %v1021_v23, %v939_v17  ;;  %v1287_v17 = vld [vmem:[#allocation4 + $0x9e8] sm:$0xff]  ;;  %v1326_v23 = vld [vmem:[#allocation4 + $0xb20] sm:$0xff] }
 0x2d3   :  { %v1090_v21 = vpop.f32.mrf.mxu0 }
 0x2d4   :  { %v2628_v24 = vadd.f32 %v1090_v21, %v1014_v19  ;;  %v1284_v19 = vld [vmem:[#allocation4 + $0x9d0] sm:$0xff]  ;;  %v1329_v21 = vld [vmem:[#allocation4 + $0xb38] sm:$0xff] }
 0x2d5   :  { %v1092_v28 = vpop.f32.mrf.mxu0 }
 0x2d6   :  { %v2630_v30 = vadd.f32 %v1092_v28, %v1016_v22  ;;  %v1251_v39 = vmax.f32 %v2628_v24, 0.0  ;;  %v1281_v22 = vld [vmem:[#allocation4 + $0x9b8] sm:$0xff]  ;;  %v1278_v28 = vld [vmem:[#allocation4 + $0x9a0] sm:$0xff] }
 0x2d7   :  { %v1096_v33 = vpop.f32.mrf.mxu0  ;;  %v1742_v24 = vld [vmem:[#allocation6 + $0x60] sm:$0xff] }
 0x2d8   :  { %v1252_v36 = vmax.f32 %v2630_v30, 0.0  ;;  %v2634_v42 = vadd.f32 %v1096_v33, %v1020_v31  ;;  %v2289_v41 = vpop.f32.mrf.mxu1  ;;  %v1323_v30 = vld [vmem:[#allocation4 + $0xb08] sm:$0xff]  ;;  %v1320_v33 = vld [vmem:[#allocation4 + $0xaf0] sm:$0xff] }
 0x2d9   :  { %v1098_v32 = vpop.f32.mrf.mxu0  ;;  %v1275_v31 = vld [vmem:[#allocation4 + $0x988] sm:$0xff] }
 0x2da   :  { %v2636_v38 = vadd.f32 %v1098_v32, %v1022_v35  ;;  %1484 = vmatprep.mubr.f32.mxu0 %v1252_v36  ;;  %v1254_v47 = vmax.f32 %v2634_v42, 0.0  ;;  %v1242_v61 = vpop.f32.mrf.mxu1  ;;  %v1272_v35 = vld [vmem:[#allocation4 + $0x970] sm:$0xff]  ;;  %v1269_v32 = vld [vmem:[#allocation4 + $0x958] sm:$0xff] }
 0x2db   :  { %1485 = vmatmul.mubr.f32.vlgmr.msra.gmra.mxu0 %v1251_v39  ;;  %v1756_v42 = vld [vmem:[#allocation6 + $0xd0] sm:$0xff] }
 0x2dc   :  { %v1255_v44 = vmax.f32 %v2636_v38, 0.0  ;;  %2291 = vmatpush3.msra.mxu0 %v1401_v1  ;;  %v1741_v38 = vld [vmem:[#allocation6 + $0x58] sm:$0xff] }
 0x2dd   :  { %2292 = vmatprep.subr.mxu0 %v1398_v43 }
 0x2de   :  { %1490 = vmatprep.mubr.f32.mxu0 %v1255_v44  ;;  %2293 = vmatpush3.msra.mxu0 %v1398_v43  ;;  %v1314_v43 = vld [vmem:[#allocation4 + $0xac0] sm:$0xff] }
 0x2df   :  { %1491 = vmatmul.mubr.f32.gmra.mxu0 %v1254_v47  ;;  %2294 = vmatprep.subr.mxu0 %v1395_v45 }
 0x2e0   :  { %2295 = vmatpush3.msra.mxu0 %v1395_v45  ;;  %v1266_v45 = vld [vmem:[#allocation4 + $0x940] sm:$0xff] }
 0x2e1   :  { %2296 = vmatprep.subr.mxu0 %v1392_v48 }
 0x2e2   :  { %2297 = vmatpush3.msra.mxu0 %v1392_v48  ;;  %v1311_v48 = vld [vmem:[#allocation4 + $0xaa8] sm:$0xff] }
 0x2e3   :  { %2298 = vmatprep.subr.mxu0 %v1389_v49 }
 0x2e4   :  { %2299 = vmatpush3.msra.mxu0 %v1389_v49  ;;  %v1263_v49 = vld [vmem:[#allocation4 + $0x928] sm:$0xff] }
 0x2e5   :  { %2300 = vmatprep.subr.mxu0 %v1386_v50 }
 0x2e6   :  { %2301 = vmatpush3.msra.mxu0 %v1386_v50  ;;  %v1308_v50 = vld [vmem:[#allocation4 + $0xa90] sm:$0xff] }
 0x2e7   :  { %2302 = vmatprep.subr.mxu0 %v1383_v46 }
 0x2e8   :  { %2303 = vmatpush3.msra.mxu0 %v1383_v46  ;;  %v1260_v46 = vld [vmem:[#allocation4 + $0x910] sm:$0xff] }
 0x2e9   :  { %2304 = vmatprep.subr.mxu0 %v1380_v51 }
 0x2ea   :  { %2305 = vmatpush3.msra.mxu0 %v1380_v51  ;;  %v1761_v51 = vld [vmem:[#allocation6 + $0xf8] sm:$0xff] }
 0x2eb   :  { %2306 = vmatprep.subr.mxu0 %v1377_v52 }
 0x2ec   :  { %2307 = vmatpush3.msra.mxu0 %v1377_v52  ;;  %v1745_v52 = vld [vmem:[#allocation6 + $0x78] sm:$0xff] }
 0x2ed   :  { %2308 = vmatprep.subr.mxu0 %v1374_v20 }
 0x2ee   :  { %2309 = vmatpush3.msra.mxu0 %v1374_v20  ;;  %v1760_v20 = vld [vmem:[#allocation6 + $0xf0] sm:$0xff] }
 0x2ef   :  { %2310 = vmatprep.subr.mxu0 %v1371_v27 }
 0x2f0   :  { %2311 = vmatpush3.msra.mxu0 %v1371_v27  ;;  %v1744_v27 = vld [vmem:[#allocation6 + $0x70] sm:$0xff] }
 0x2f1   :  { %2312 = vmatprep.subr.mxu0 %v1368_v37 }
 0x2f2   :  { %2313 = vmatpush3.msra.mxu0 %v1368_v37  ;;  %v1759_v37 = vld [vmem:[#allocation6 + $0xe8] sm:$0xff] }
 0x2f3   :  { %v2049_v54 = vpop.f32.mrf.mxu0  ;;  %2314 = vmatprep.subr.mxu0 %v1365_v40 }
 0x2f4   :  { %2315 = vmatpush3.msra.mxu0 %v1365_v40  ;;  %v1743_v40 = vld [vmem:[#allocation6 + $0x68] sm:$0xff] }
 0x2f5   :  { %v2050_v56 = vpop.f32.mrf.mxu0  ;;  %2316 = vmatprep.subr.mxu0 %v1362_v53 }
 0x2f6   :  { %v2051_v57 = vadd.f32 %v2050_v56, %v2049_v54  ;;  %2317 = vmatpush3.msra.mxu0 %v1362_v53  ;;  %v1758_v53 = vld [vmem:[#allocation6 + $0xe0] sm:$0xff]  ;;  %v1739_v54 = vld [vmem:[#allocation6 + $0x48] sm:$0xff]  ;;  %v1737_v56 = vld [vmem:[#allocation6 + $0x38] sm:$0xff] }
 0x2f7   :  { %v2052_v59 = vpop.f32.mrf.mxu0  ;;  %2318 = vmatprep.subr.mxu0 %v1359_v34 }
 0x2f8   :  { %v1168_v60 = vadd.f32 %v2051_v57, %v943_v55  ;;  %2319 = vmatpush3.msra.mxu0 %v1359_v34  ;;  %v1738_v34 = vld [vmem:[#allocation6 + $0x40] sm:$0xff]  ;;  %v1752_v57 = vld [vmem:[#allocation6 + $0xb0] sm:$0xff] }
 0x2f9   :  { %v2053_v62 = vpop.f32.mrf.mxu0  ;;  %2320 = vmatprep.subr.mxu0 %v1356_v58 }
 0x2fa   :  { %v1243_v63 = vadd.f32 %v1242_v61, %v1168_v60  ;;  %v2054_v1 = vadd.f32 %v2053_v62, %v2052_v59  ;;  %2321 = vmatpush3.msra.mxu0 %v1356_v58  ;;  %v1736_v58 = vld [vmem:[#allocation6 + $0x30] sm:$0xff]  ;;  %v1751_v59 = vld [vmem:[#allocation6 + $0xa8] sm:$0xff]  ;;  %v1750_v61 = vld [vmem:[#allocation6 + $0xa0] sm:$0xff] }
 0x2fb   :  { %v1735_v60 = vld [vmem:[#allocation6 + $0x28] sm:$0xff]  ;;  %v1734_v62 = vld [vmem:[#allocation6 + $0x20] sm:$0xff] }
 0x2fc   :  { %v1253_v2 = vmax.f32 %v1243_v63, 0.0  ;;  %v1173_v3 = vadd.f32 %v2054_v1, %v943_v55  ;;  %v1754_v55 = vld [vmem:[#allocation6 + $0xc0] sm:$0xff]  ;;  %v1749_v63 = vld [vmem:[#allocation6 + $0x98] sm:$0xff] }
 0x2fd   :  { %v1733_v1 = vld [vmem:[#allocation6 + $0x18] sm:$0xff] }
 0x2fe   :  { %1562 = vmatmul.mubr.f32.vlgmr.msra.gmra.mxu1 %v1253_v2  ;;  %2322 = vmatprep.mubr.f32.mxu0 %v1253_v2  ;;  %v1248_v7 = vadd.f32 %v2289_v41, %v1173_v3  ;;  %v1753_v41 = vld [vmem:[#allocation6 + $0xb8] sm:$0xff]  ;;  %v1748_v2 = vld [vmem:[#allocation6 + $0x90] sm:$0xff] }
 0x2ff   :  { %2074 = vmatpush3.msra.mxu1 %v1305_v4  ;;  %1567 = vmatprep.mubr.f32.mxu1 %v2485_v0  ;;  %v1290_v0 = vld [vmem:[#allocation4 + $0xa00] sm:$0xff]  ;;  %v1732_v3 = vld [vmem:[#allocation6 + $0x10] sm:$0xff]  ;;  %v1747_v4 = vld [vmem:[#allocation6 + $0x88] sm:$0xff] }
 0x300   :  { %2075 = vmatprep.subr.mxu1 %v1350_v5  ;;  %v1256_v9 = vmax.f32 %v1248_v7, 0.0  ;;  %v1731_v5 = vld [vmem:[#allocation6 + $0x8] sm:$0xff]  ;;  %v1730_v7 = vld [vmem:[#allocation6] sm:$0xff] }
 0x301   :  { %2076 = vmatpush3.msra.mxu1 %v1302_v6  ;;  %v1746_v6 = vld [vmem:[#allocation6 + $0x80] sm:$0xff] }
 0x302   :  { %2077 = vmatprep.subr.mxu1 %v1347_v8  ;;  %1568 = vmatmul.mubr.f32.gmra.mxu1 %v1256_v9  ;;  %v1777_v8 = vld [vmem:[#allocation6 + $0x178] sm:$0xff] }
 0x303   :  { %2078 = vmatpush3.msra.mxu1 %v1299_v10  ;;  %2323 = vmatmul.mubr.f32.vlgmr.msra.gmra.mxu0 %v1256_v9  ;;  %v1776_v9 = vld [vmem:[#allocation6 + $0x170] sm:$0xff]  ;;  %v1775_v10 = vld [vmem:[#allocation6 + $0x168] sm:$0xff] }
 0x304   :  { %2079 = vmatprep.subr.mxu1 %v1344_v11  ;;  %1638 = vmatprep.mubr.f32.mxu1 %v1252_v36  ;;  %v1317_v36 = vld [vmem:[#allocation4 + $0xad8] sm:$0xff]  ;;  %v1774_v11 = vld [vmem:[#allocation6 + $0x160] sm:$0xff] }
 0x305   :  { %2080 = vmatpush3.msra.mxu1 %v1296_v12  ;;  %2325 = vmatprep.subr.mxu0 %v1777_v8  ;;  %v1773_v12 = vld [vmem:[#allocation6 + $0x158] sm:$0xff] }
 0x306   :  { %2081 = vmatprep.subr.mxu1 %v1341_v13  ;;  %2326 = vmatpush3.msra.mxu0 %v1777_v8  ;;  %v1772_v13 = vld [vmem:[#allocation6 + $0x150] sm:$0xff] }
 0x307   :  { %2082 = vmatpush3.msra.mxu1 %v1293_v14  ;;  %2327 = vmatprep.subr.mxu0 %v1776_v9  ;;  %v1771_v14 = vld [vmem:[#allocation6 + $0x148] sm:$0xff] }
 0x308   :  { %2083 = vmatprep.subr.mxu1 %v1338_v15  ;;  %2328 = vmatpush3.msra.mxu0 %v1776_v9  ;;  %v1770_v15 = vld [vmem:[#allocation6 + $0x140] sm:$0xff] }
 0x309   :  { %2084 = vmatpush3.msra.mxu1 %v1290_v0  ;;  %2329 = vmatprep.subr.mxu0 %v1775_v10  ;;  %v1769_v0 = vld [vmem:[#allocation6 + $0x138] sm:$0xff] }
 0x30a   :  { %2085 = vmatprep.subr.mxu1 %v1335_v16  ;;  %2330 = vmatpush3.msra.mxu0 %v1775_v10  ;;  %v1768_v16 = vld [vmem:[#allocation6 + $0x130] sm:$0xff] }
 0x30b   :  { %2086 = vmatpush3.msra.mxu1 %v1287_v17  ;;  %2331 = vmatprep.subr.mxu0 %v1774_v11  ;;  %v1767_v17 = vld [vmem:[#allocation6 + $0x128] sm:$0xff] }
 0x30c   :  { %2087 = vmatprep.subr.mxu1 %v1332_v18  ;;  %2332 = vmatpush3.msra.mxu0 %v1774_v11  ;;  %v1766_v18 = vld [vmem:[#allocation6 + $0x120] sm:$0xff] }
 0x30d   :  { %2088 = vmatpush3.msra.mxu1 %v1284_v19  ;;  %2333 = vmatprep.subr.mxu0 %v1773_v12  ;;  %v1765_v19 = vld [vmem:[#allocation6 + $0x118] sm:$0xff] }
 0x30e   :  { %2089 = vmatprep.subr.mxu1 %v1329_v21  ;;  %2334 = vmatpush3.msra.mxu0 %v1773_v12  ;;  %v1764_v21 = vld [vmem:[#allocation6 + $0x110] sm:$0xff] }
 0x30f   :  { %2090 = vmatpush3.msra.mxu1 %v1281_v22  ;;  %2335 = vmatprep.subr.mxu0 %v1772_v13  ;;  %v1763_v22 = vld [vmem:[#allocation6 + $0x108] sm:$0xff] }
 0x310   :  { %2091 = vmatprep.subr.mxu1 %v1326_v23  ;;  %2336 = vmatpush3.msra.mxu0 %v1772_v13  ;;  %v1762_v23 = vld [vmem:[#allocation6 + $0x100] sm:$0xff] }
 0x311   :  { %2092 = vmatpush3.msra.mxu1 %v1278_v28  ;;  %2337 = vmatprep.subr.mxu0 %v1771_v14 }
 0x312   :  { %2093 = vmatprep.subr.mxu1 %v1323_v30  ;;  %2338 = vmatpush3.msra.mxu0 %v1771_v14  ;;  %v1403_v30 = vld [vmem:[#allocation7 + $0x3] ss:$8 sm:$0x7] }
 0x313   :  { %2094 = vmatpush3.msra.mxu1 %v1275_v31  ;;  %2339 = vmatprep.subr.mxu0 %v1770_v15 }
 0x314   :  { %2095 = vmatprep.subr.mxu1 %v1320_v33  ;;  %2340 = vmatpush3.msra.mxu0 %v1770_v15  ;;  %v1408_v33 = vrot.slane %v1403_v30, %v2545_v25 }
 0x315   :  { %2096 = vmatpush3.msra.mxu1 %v1272_v35  ;;  %2341 = vmatprep.subr.mxu0 %v1769_v0  ;;  %v1412_v35 = vrot.slane %v1403_v30, %v2547_v26 }
 0x316   :  { %2097 = vmatprep.subr.mxu1 %v1317_v36  ;;  %2342 = vmatpush3.msra.mxu0 %v1769_v0 }
 0x317   :  { %2098 = vmatpush3.msra.mxu1 %v1269_v32  ;;  %2343 = vmatprep.subr.mxu0 %v1768_v16 }
 0x318   :  { %2099 = vmatprep.subr.mxu1 %v1314_v43  ;;  %2344 = vmatpush3.msra.mxu0 %v1768_v16 }
 0x319   :  { %2100 = vmatpush3.msra.mxu1 %v1266_v45  ;;  %2345 = vmatprep.subr.mxu0 %v1767_v17 }
 0x31a   :  { %2101 = vmatprep.subr.mxu1 %v1311_v48  ;;  %2346 = vmatpush3.msra.mxu0 %v1767_v17 }
 0x31b   :  { %2102 = vmatpush3.msra.mxu1 %v1263_v49  ;;  %2347 = vmatprep.subr.mxu0 %v1766_v18 }
 0x31c   :  { %2103 = vmatprep.subr.mxu1 %v1308_v50  ;;  %2348 = vmatpush3.msra.mxu0 %v1766_v18 }
 0x31d   :  { %2104 = vmatpush3.msra.mxu1 %v1260_v46  ;;  %2349 = vmatprep.subr.mxu0 %v1765_v19 }
 0x31e   :  { %1639 = vmatmul.mubr.f32.vlgmr.msra.gmra.mxu1 %v1251_v39  ;;  %2129 = vmatprep.subr.mxu1 %v1761_v51  ;;  %v1757_v39 = vld [vmem:[#allocation6 + $0xd8] sm:$0xff] }
 0x31f   :  { %1643 = vmatprep.mubr.f32.mxu1 %v1255_v44  ;;  %2130 = vmatpush3.msra.mxu1 %v1745_v52  ;;  %v1740_v44 = vld [vmem:[#allocation6 + $0x50] sm:$0xff] }
 0x320   :  { %2131 = vmatprep.subr.mxu1 %v1760_v20  ;;  %2350 = vmatpush3.msra.mxu0 %v1765_v19 }
 0x321   :  { %2132 = vmatpush3.msra.mxu1 %v1744_v27  ;;  %2351 = vmatprep.subr.mxu0 %v1764_v21 }
 0x322   :  { %1644 = vmatmul.mubr.f32.gmra.mxu1 %v1254_v47  ;;  %2133 = vmatprep.subr.mxu1 %v1759_v37  ;;  %v1755_v47 = vld [vmem:[#allocation6 + $0xc8] sm:$0xff] }
 0x323   :  { %2134 = vmatpush3.msra.mxu1 %v1743_v40  ;;  %2352 = vmatpush3.msra.mxu0 %v1764_v21 }
 0x324   :  { %2135 = vmatprep.subr.mxu1 %v1758_v53  ;;  %2353 = vmatprep.subr.mxu0 %v1763_v22 }
 0x325   :  { %2136 = vmatpush3.msra.mxu1 %v1742_v24  ;;  %2354 = vmatpush3.msra.mxu0 %v1763_v22 }
 0x326   :  { %2137 = vmatprep.subr.mxu1 %v1757_v39  ;;  %2355 = vmatprep.subr.mxu0 %v1762_v23 }
 0x327   :  { %2138 = vmatpush3.msra.mxu1 %v1741_v38  ;;  %2356 = vmatpush3.msra.mxu0 %v1762_v23  ;;  %v1416_v38 = vrot.slane %v1403_v30, %v2550_v29 }
 0x328   :  { %2139 = vmatprep.subr.mxu1 %v1756_v42 }
 0x329   :  { %2140 = vmatpush3.msra.mxu1 %v1740_v44 }
 0x32a   :  { %2141 = vmatprep.subr.mxu1 %v1755_v47 }
 0x32b   :  { %2142 = vmatpush3.msra.mxu1 %v1739_v54 }
 0x32c   :  { %2143 = vmatprep.subr.mxu1 %v1754_v55 }
 0x32d   :  { %2144 = vmatpush3.msra.mxu1 %v1738_v34 }
 0x32e   :  { %2145 = vmatprep.subr.mxu1 %v1753_v41 }
 0x32f   :  { %2146 = vmatpush3.msra.mxu1 %v1737_v56 }
 0x330   :  { %2147 = vmatprep.subr.mxu1 %v1752_v57 }
 0x331   :  { %2148 = vmatpush3.msra.mxu1 %v1736_v58 }
 0x332   :  { %2149 = vmatprep.subr.mxu1 %v1751_v59 }
 0x333   :  { %2150 = vmatpush3.msra.mxu1 %v1735_v60 }
 0x334   :  { %2151 = vmatprep.subr.mxu1 %v1750_v61 }
 0x335   :  { %2152 = vmatpush3.msra.mxu1 %v1734_v62 }
 0x336   :  { %2153 = vmatprep.subr.mxu1 %v1749_v63 }
 0x337   :  { %2154 = vmatpush3.msra.mxu1 %v1733_v1 }
 0x338   :  { %2155 = vmatprep.subr.mxu1 %v1748_v2 }
 0x339   :  { %2156 = vmatpush3.msra.mxu1 %v1732_v3 }
 0x33a   :  { %2157 = vmatprep.subr.mxu1 %v1747_v4  ;;  %v1942_v4 = vld [vmem:[#allocation9] ss:$0 sm:$0xff] }
 0x33b   :  { %2158 = vmatpush3.msra.mxu1 %v1731_v5 }
 0x33c   :  { %2159 = vmatprep.subr.mxu1 %v1746_v6 }
 0x33d   :  { %2160 = vmatpush3.msra.mxu1 %v1730_v7 }
 0x39b   :  { %v1486_v28 = vpop.f32.mrf.mxu0 }
 0x39c   :  { %v1487_v32 = vadd.f32 %v1486_v28, %v1408_v33 }
 0x39d   :  { %v1488_v31 = vpop.f32.mrf.mxu0 }
 0x39e   :  { %v1489_v45 = vadd.f32 %v1488_v31, %v1412_v35 }
 0x39f   :  { %v1492_v36 = vpop.f32.mrf.mxu0 }
 0x3a0   :  { %v1493_v51 = vadd.f32 %v1492_v36, %v1408_v33 }
 0x3a1   :  { %v1494_v48 = vpop.f32.mrf.mxu0 }
 0x3a2   :  { %v1495_v20 = vadd.f32 %v1494_v48, %v1412_v35 }
 0x3be   :  { %v1563_v43 = vpop.f32.mrf.mxu1 }
 0x3bf   :  { %v1564_v49 = vadd.f32 %v1563_v43, %v1487_v32 }
 0x3c0   :  { %v1565_v50 = vpop.f32.mrf.mxu1 }
 0x3c1   :  { %v1566_v46 = vadd.f32 %v1565_v50, %v1489_v45  ;;  %v1724_v37 = vmax.f32 %v1564_v49, 0.0 }
 0x3c2   :  { %v1569_v52 = vpop.f32.mrf.mxu1 }
 0x3c3   :  { %v1725_v27 = vmax.f32 %v1566_v46, 0.0  ;;  %v1570_v40 = vadd.f32 %v1569_v52, %v1493_v51  ;;  %v2324_v42 = vpop.f32.mrf.mxu0 }
 0x3c4   :  { %v1571_v53 = vpop.f32.mrf.mxu1 }
 0x3c5   :  { %v1572_v24 = vadd.f32 %v1571_v53, %v1495_v20  ;;  %1847 = vmatprep.mubr.f32.mxu1 %v1725_v27  ;;  %v1727_v26 = vmax.f32 %v1570_v40, 0.0  ;;  %v1715_v34 = vpop.f32.mrf.mxu0 }
 0x3c6   :  { %1848 = vmatmul.mubr.f32.vlgmr.msra.gmra.mxu1 %v1724_v37 }
 0x3c7   :  { %v1728_v25 = vmax.f32 %v1572_v24, 0.0 }
 0x3c9   :  { %1852 = vmatprep.mubr.f32.mxu1 %v1728_v25 }
 0x3ca   :  { %1853 = vmatmul.mubr.f32.gmra.mxu1 %v1727_v26 }
 0x3de   :  { %v2105_v39 = vpop.f32.mrf.mxu1 }
 0x3e0   :  { %v2106_v44 = vpop.f32.mrf.mxu1 }
 0x3e1   :  { %v2107_v47 = vadd.f32 %v2106_v44, %v2105_v39 }
 0x3e2   :  { %v2108_v54 = vpop.f32.mrf.mxu1 }
 0x3e3   :  { %v1641_v55 = vadd.f32 %v2107_v47, %v1416_v38 }
 0x3e4   :  { %v2109_v41 = vpop.f32.mrf.mxu1 }
 0x3e5   :  { %v2110_v56 = vadd.f32 %v2109_v41, %v2108_v54  ;;  %v1716_v57 = vadd.f32 %v1715_v34, %v1641_v55 }
 0x3e7   :  { %v1646_v58 = vadd.f32 %v2110_v56, %v1416_v38  ;;  %v1726_v59 = vmax.f32 %v1716_v57, 0.0 }
 0x3e9   :  { %v1721_v60 = vadd.f32 %v2324_v42, %v1646_v58  ;;  %2357 = vmatprep.mubr.f32.mxu0 %v1726_v59 }
 0x3eb   :  { %v1729_v61 = vmax.f32 %v1721_v60, 0.0 }
 0x3ed   :  { %2358 = vmatmul.mubr.f32.vlgmr.msra.gmra.mxu0 %v1729_v61 }
 0x486   :  { %v2161_v62 = vpop.f32.mrf.mxu1 }
 0x488   :  { %v2162_v63 = vpop.f32.mrf.mxu1 }
 0x489   :  { %v2163_v3 = vadd.f32 %v2162_v63, %v2161_v62 }
 0x48a   :  { %v2164_v1 = vpop.f32.mrf.mxu1 }
 0x48b   :  { %v1850_v8 = vadd.f32 %v2163_v3, %v1942_v4 }
 0x48c   :  { %v2165_v2 = vpop.f32.mrf.mxu1 }
 0x48d   :  { %v2166_v29 = vadd.f32 %v2165_v2, %v2164_v1 }
 0x48f   :  { %v1855_v5 = vadd.f32 %v2166_v29, %v1942_v4 }
 0x4ad   :  { %v2359_v6 = vpop.f32.mrf.mxu0 }
 0x4ae   :  { %v1930_v7 = vadd.f32 %v2359_v6, %v1855_v5 }
 0x4af   :  { %v1924_v9 = vpop.f32.mrf.mxu0 }
 0x4b0   :  { %1934 = vst [vmem:[%s2674_s6 + $0x8] sm:$0xff] %v1930_v7  ;;  %v1925_v10 = vadd.f32 %v1924_v9, %v1850_v8 }
 0x4b2   :  { %1933 = vst [vmem:[%s2674_s6] sm:$0xff] %v1925_v10 }
 0x4b3   :  { %1939 = vsyncpa [#allocation3], 1 }
 0x4b4   :  { %1940 = vsyncpa [#allocation5], 1 }
 0x4b5   :  { %1941 = vsyncpa [#allocation8], 1 }

</bundles_post_ra>
